<compile_context>
chip_gen: v7x
topology: tpu7x:2x2x1
jax: 0.10.0
libtpu: 0.0.40
codegen_flags: <defaults>
</compile_context>

<pallas_src>
import functools

import jax
import jax.numpy as jnp
from jax.experimental import pallas as pl
from jax.experimental.pallas import tpu as pltpu

_COMPUTE_DTYPE = jnp.bfloat16   # MXU-native operand dtype on v5e/v6e/v7x


# ---------------------------------------------------------------------------
# In-kernel attention core (shared by the fused self-attn and general kernels)
# ---------------------------------------------------------------------------
def _attention_core(Q, K, V, mask_bias, wo_t, bo, n_heads, scale):
    """Q: (N, D) f32, K/V: (M, D) f32, mask_bias: (N, M) f32 additive bias.

    Heads are split with reshape + pltpu.einshape (layout plumbing, no
    per-head Python loop); scores and P@V are head-batched bf16 MXU einsums
    with f32 accumulation; softmax stays in f32.
    """
    N, D = Q.shape
    dk = D // n_heads

    def split_heads(x):                       # (S, D) f32 -> (H, S, dk) bf16
        xh = x.reshape(x.shape[0], n_heads, dk)
        return pltpu.einshape("shd->hsd", xh).astype(_COMPUTE_DTYPE)

    Qh, Kh, Vh = split_heads(Q), split_heads(K), split_heads(V)

    # Scores for all heads at once: (H, N, M), f32 off the MXU.
    s = jnp.einsum("hnd,hmd->hnm", Qh, Kh,
                   preferred_element_type=jnp.float32) * scale
    s = s + mask_bias[None, :, :]             # additive mask, broadcast once

    # Numerically stable softmax in f32; the divide runs on the EUP.
    s = s - jnp.max(s, axis=-1, keepdims=True)
    e = jnp.exp(s)
    p = e * pl.reciprocal(jnp.sum(e, axis=-1, keepdims=True), approx=True)

    # P@V for all heads; probabilities cast to the bf16 MXU operand dtype.
    oh = jnp.einsum("hnm,hmd->hnd", p.astype(Vh.dtype), Vh,
                    preferred_element_type=jnp.float32)      # (H, N, dk) f32

    # Merge heads -> (N, D), then ONE output projection matmul.
    merged = pltpu.einshape("hnd->nhd", oh).reshape(N, D).astype(wo_t.dtype)
    return jnp.dot(merged, wo_t, preferred_element_type=jnp.float32) + bo
    # TODO(synk): at realistic N/M, tile the KV axis (flash-style online
    # softmax: pl.when init/finalize + VMEM scratch m/l/acc) instead of
    # materializing the full (H, N, M) score tensor.


# ---------------------------------------------------------------------------
# Kernels (one batch element per grid step)
# ---------------------------------------------------------------------------
def _mha_self_kernel(n_heads, scale,
                     mask_ref, x_ref, wqkv_ref, bqkv_ref, wo_ref, bo_ref,
                     o_ref):
    """Self-attention: one fused (N, D) x (D, 3D) bf16 QKV matmul + bias."""
    x = x_ref[...]                                            # (N, D) bf16
    D = x.shape[-1]
    qkv = (jnp.dot(x, wqkv_ref[...], preferred_element_type=jnp.float32)
           + bqkv_ref[...])                                   # (N, 3D) f32
    Q, K, V = qkv[:, :D], qkv[:, D:2 * D], qkv[:, 2 * D:]
    y = _attention_core(Q, K, V, mask_ref[...], wo_ref[...], bo_ref[...],
                        n_heads, scale)
    # TODO(synk): at real d_model, make the stored block lane-dense (D a
    # multiple of 128, or pad lanes in the wrapper) to avoid masked vst.
    o_ref[...] = y.astype(o_ref.dtype)


def _mha_general_kernel(n_heads, scale,
                        mask_ref, q_ref, k_ref, v_ref,
                        wq_ref, wk_ref, wv_ref, wo_ref,
                        bq_ref, bk_ref, bv_ref, bo_ref,
                        o_ref):
    """General query / key / value (e.g. cross-attention)."""
    Q = (jnp.dot(q_ref[...], wq_ref[...], preferred_element_type=jnp.float32)
         + bq_ref[...])
    K = (jnp.dot(k_ref[...], wk_ref[...], preferred_element_type=jnp.float32)
         + bk_ref[...])
    V = (jnp.dot(v_ref[...], wv_ref[...], preferred_element_type=jnp.float32)
         + bv_ref[...])
    y = _attention_core(Q, K, V, mask_ref[...], wo_ref[...], bo_ref[...],
                        n_heads, scale)
    o_ref[...] = y.astype(o_ref.dtype)


# ---------------------------------------------------------------------------
# BlockSpecs
# ---------------------------------------------------------------------------
def _batch_spec(shape):
    """Batched operand: squeezed leading batch dim, full (S, D) block."""
    _, S, D = shape
    return pl.BlockSpec((pl.Squeezed(), S, D), lambda b: (b, 0, 0))


def _invariant_spec(shape, single_buffer):
    """Grid-invariant operand (weights / biases / mask): full block, index 0.

    single_buffer=True requests pl.Buffered(1) so the operand is not
    double-buffered in VMEM (it never changes across the grid).
    """
    nd = len(shape)
    index_map = lambda b, _nd=nd: (0,) * _nd
    if single_buffer:
        return pl.BlockSpec(shape, index_map, pipeline_mode=pl.Buffered(1))
    return pl.BlockSpec(shape, index_map)


# ---------------------------------------------------------------------------
# Wrapper
# ---------------------------------------------------------------------------
def multi_head_attention(query, key, value, params, mask, n_heads):
    """Forward pass of the PyTorch MultiHeadAttention module (eval mode).

    Dropout(p=0.1) on the attention weights is identity in eval mode.
    """
    B, N, D = query.shape
    M = key.shape[1]
    dk = D // n_heads
    scale = 1.0 / (dk ** 0.5)
    out_dtype = query.dtype
    cdt = _COMPUTE_DTYPE

    # Additive mask bias precomputed once (0 visible, -1e9 masked), f32.
    # TODO(synk): for causal masks at realistic N/M, generate the bias
    # in-kernel with broadcasted_iota compares instead of DMA'ing (N, M) f32.
    if mask is None:
        mask_bias = jnp.zeros((N, M), jnp.float32)
    else:
        mask_bias = jnp.where(mask == 0, -1e9, 0.0).astype(jnp.float32)

    # Hoist weight transposes and bf16 casts to the wrapper (one-time XLA
    # ops); biases stay f32 since they are added to f32 accumulators.
    # TODO(synk): on v7x, fp8 weights with per-channel scales would halve
    # weight HBM traffic / VMEM residency for inference.
    wo_t = params["wo"].T.astype(cdt)
    bo = params["bo"].astype(jnp.float32)

    # Fused-QKV routing on object identity (equal-but-distinct arrays fall
    # back to the numerically identical general path -- perf, not correctness).
    self_attn = (key is query) and (value is query)

    if self_attn:
        wqkv_t = jnp.concatenate(
            [params["wq"].T, params["wk"].T, params["wv"].T],
            axis=1).astype(cdt)                                   # (D, 3D)
        bqkv = jnp.concatenate(
            [params["bq"], params["bk"], params["bv"]],
            axis=1).astype(jnp.float32)                           # (1, 3D)
        inputs = [mask_bias, query.astype(cdt), wqkv_t, bqkv, wo_t, bo]
        batched = [False, True, False, False, False, False]
        kernel = functools.partial(_mha_self_kernel, n_heads, scale)
    else:
        inputs = [mask_bias, query.astype(cdt), key.astype(cdt),
                  value.astype(cdt),
                  params["wq"].T.astype(cdt), params["wk"].T.astype(cdt),
                  params["wv"].T.astype(cdt), wo_t,
                  params["bq"].astype(jnp.float32),
                  params["bk"].astype(jnp.float32),
                  params["bv"].astype(jnp.float32), bo]
        batched = [False, True, True, True] + [False] * 8
        kernel = functools.partial(_mha_general_kernel, n_heads, scale)

    def launch(single_buffer_invariants):
        in_specs = [
            _batch_spec(a.shape) if is_b
            else _invariant_spec(a.shape, single_buffer_invariants)
            for a, is_b in zip(inputs, batched)
        ]
        return pl.pallas_call(
            kernel,
            out_shape=jax.ShapeDtypeStruct((B, N, D), out_dtype),
            grid=(B,),
            in_specs=in_specs,
            out_specs=pl.BlockSpec((pl.Squeezed(), N, D),
                                   lambda b: (b, 0, 0)),
            compiler_params=pltpu.CompilerParams(
                # v7x: one batch element per TensorCore; v5e/v6e: short serial
                # loop (parallel vs arbitrary is a measured no-op there).
                dimension_semantics=("parallel",),
                # Default VMEM limit is plenty at these shapes; at realistic
                # tiles re-derive against 64 MiB (v7x) / 128 MiB (v5e/v6e).
            ),
        )(*inputs)

    try:
        # Preferred path: single-buffered grid-invariant weights/biases/mask.
        return launch(single_buffer_invariants=True)
    except Exception:
        # Compatibility guard: fall back to default (double) buffering if this
        # jax build rejects pipeline_mode on the main pallas_call path.
        return launch(single_buffer_invariants=False)


# ---------------------------------------------------------------------------
# Pure-JAX reference (mirrors the PyTorch forward in eval mode, f32)
# ---------------------------------------------------------------------------
def reference_mha(query, key, value, p, mask, n_heads):
    B, N, D = query.shape
    M = key.shape[1]
    dk = D // n_heads
    Q = query @ p["wq"].T + p["bq"]
    K = key @ p["wk"].T + p["bk"]
    V = value @ p["wv"].T + p["bv"]
    Q = Q.reshape(B, N, n_heads, dk).transpose(0, 2, 1, 3)
    K = K.reshape(B, M, n_heads, dk).transpose(0, 2, 1, 3)
    V = V.reshape(B, M, n_heads, dk).transpose(0, 2, 1, 3)
    s = jnp.matmul(Q, K.transpose(0, 1, 3, 2)) / dk ** 0.5
    if mask is not None:
        s = jnp.where(mask[None, None] == 0, -1e9, s)
    w = jax.nn.softmax(s, axis=-1)
    o = jnp.matmul(w, V).transpose(0, 2, 1, 3).reshape(B, N, D)
    return o @ p["wo"].T + p["bo"]


# ---------------------------------------------------------------------------
# Main
# ---------------------------------------------------------------------------
if __name__ == "__main__":
    B, N, M = 2, 8, 8          # batch, query seq len, key/value seq len
    d_model, n_heads = 32, 4

    rng = jax.random.PRNGKey(0)
    keys = iter(jax.random.split(rng, 16))

    def w(shape, sc=0.05):
        return (sc * jax.random.normal(next(keys), shape)).astype(jnp.float32)

    params = {
        "wq": w((d_model, d_model)), "wk": w((d_model, d_model)),
        "wv": w((d_model, d_model)), "wo": w((d_model, d_model)),
        "bq": w((1, d_model)), "bk": w((1, d_model)),
        "bv": w((1, d_model)), "bo": w((1, d_model)),
    }

    x = jax.random.normal(next(keys), (B, N, d_model), jnp.float32)
    mem = jax.random.normal(next(keys), (B, M, d_model), jnp.float32)
    causal = jnp.tril(jnp.ones((N, N), jnp.float32))   # mask==0 -> -1e9 score

    # bf16 MXU operands + approx reciprocal trade ~1e-3-level accuracy vs the
    # f32 reference; tolerance set accordingly.
    tol = dict(atol=2e-2, rtol=2e-2)

    # 1) masked self-attention -> fused-QKV kernel path
    out_self = jax.block_until_ready(
        multi_head_attention(x, x, x, params, causal, n_heads))
    ref_self = reference_mha(x, x, x, params, causal, n_heads)
    assert out_self.shape == (B, N, d_model)
    assert jnp.allclose(out_self, ref_self, **tol), (
        "self-attention mismatch vs reference, max abs err = "
        f"{jnp.max(jnp.abs(out_self - ref_self))}")

    # 2) unmasked cross-attention -> general kernel path
    out_cross = jax.block_until_ready(
        multi_head_attention(x, mem, mem, params, None, n_heads))
    ref_cross = reference_mha(x, mem, mem, params, None, n_heads)
    assert jnp.allclose(out_cross, ref_cross, **tol), (
        "cross-attention mismatch vs reference, max abs err = "
        f"{jnp.max(jnp.abs(out_cross - ref_cross))}")

    print("KERNEL_OK")
</pallas_src>

<mosaic_0001>
module attributes {stable_mosaic.version = 11 : i64} {
  func.func @_mha_self_kernel(%arg0: i32, %arg1: memref<8x8xf32, #tpu.memory_space<vmem>>, %arg2: memref<1x8x32xbf16, #tpu.memory_space<vmem>>, %arg3: memref<32x96xbf16, #tpu.memory_space<vmem>>, %arg4: memref<1x96xf32, #tpu.memory_space<vmem>>, %arg5: memref<32x32xbf16, #tpu.memory_space<vmem>>, %arg6: memref<1x32xf32, #tpu.memory_space<vmem>>, %arg7: memref<1x8x32xf32, #tpu.memory_space<vmem>>) attributes {dimension_semantics = [#tpu.dimension_semantics<parallel>], iteration_bounds = array<i64: 2>, scalar_prefetch = 0 : i64, scratch_operands = 0 : i64, tpu.core_type = #tpu.core_type<tc>, window_params = [{pipeline_mode = #tpu.pipeline_mode<synchronous>, transform_indices = @transform_0, window_bounds = array<i64: 8, 8>}, {transform_indices = @transform_1, window_bounds = array<i64: 1, 8, 32>}, {pipeline_mode = #tpu.pipeline_mode<synchronous>, transform_indices = @transform_2, window_bounds = array<i64: 32, 96>}, {pipeline_mode = #tpu.pipeline_mode<synchronous>, transform_indices = @transform_3, window_bounds = array<i64: 1, 96>}, {pipeline_mode = #tpu.pipeline_mode<synchronous>, transform_indices = @transform_4, window_bounds = array<i64: 32, 32>}, {pipeline_mode = #tpu.pipeline_mode<synchronous>, transform_indices = @transform_5, window_bounds = array<i64: 1, 32>}, {transform_indices = @transform_6, window_bounds = array<i64: 1, 8, 32>}]} {
    %c0 = arith.constant 0 : index
    %c0_0 = arith.constant 0 : index
    %c0_1 = arith.constant 0 : index
    %0 = vector.load %arg2[%c0, %c0_0, %c0_1] : memref<1x8x32xbf16, #tpu.memory_space<vmem>>, vector<1x8x32xbf16>
    %1 = vector.shape_cast %0 : vector<1x8x32xbf16> to vector<8x32xbf16>
    %c0_2 = arith.constant 0 : index
    %c0_3 = arith.constant 0 : index
    %2 = vector.load %arg3[%c0_2, %c0_3] : memref<32x96xbf16, #tpu.memory_space<vmem>>, vector<32x96xbf16>
    %cst = arith.constant dense<0.000000e+00> : vector<8x96xf32>
    %3 = tpu.matmul %1, %2, %cst {dimension_numbers = #tpu.dot_dimension_numbers<[1], [0], [0], [1], [0, 0, 1, 1], [], []>} : vector<8x32xbf16>, vector<32x96xbf16>, vector<8x96xf32> -> vector<8x96xf32>
    %c0_4 = arith.constant 0 : index
    %c0_5 = arith.constant 0 : index
    %4 = vector.load %arg4[%c0_4, %c0_5] : memref<1x96xf32, #tpu.memory_space<vmem>>, vector<1x96xf32>
    %5 = vector.broadcast %4 : vector<1x96xf32> to vector<8x96xf32>
    %6 = arith.addf %3, %5 : vector<8x96xf32>
    %7 = vector.extract_strided_slice %6 {offsets = [0, 0], sizes = [8, 32], strides = [1, 1]} : vector<8x96xf32> to vector<8x32xf32>
    %8 = vector.extract_strided_slice %6 {offsets = [0, 32], sizes = [8, 32], strides = [1, 1]} : vector<8x96xf32> to vector<8x32xf32>
    %9 = vector.extract_strided_slice %6 {offsets = [0, 64], sizes = [8, 32], strides = [1, 1]} : vector<8x96xf32> to vector<8x32xf32>
    %c0_6 = arith.constant 0 : index
    %c0_7 = arith.constant 0 : index
    %10 = vector.load %arg1[%c0_6, %c0_7] : memref<8x8xf32, #tpu.memory_space<vmem>>, vector<8x8xf32>
    %c0_8 = arith.constant 0 : index
    %c0_9 = arith.constant 0 : index
    %11 = vector.load %arg5[%c0_8, %c0_9] : memref<32x32xbf16, #tpu.memory_space<vmem>>, vector<32x32xbf16>
    %c0_10 = arith.constant 0 : index
    %c0_11 = arith.constant 0 : index
    %12 = vector.load %arg6[%c0_10, %c0_11] : memref<1x32xf32, #tpu.memory_space<vmem>>, vector<1x32xf32>
    %13 = vector.shape_cast %7 : vector<8x32xf32> to vector<8x4x8xf32>
    %14 = tpu.transpose %13, [1, 0, 2] : vector<8x4x8xf32> -> vector<4x8x8xf32>
    %15 = arith.truncf %14 : vector<4x8x8xf32> to vector<4x8x8xbf16>
    %16 = vector.shape_cast %8 : vector<8x32xf32> to vector<8x4x8xf32>
    %17 = tpu.transpose %16, [1, 0, 2] : vector<8x4x8xf32> -> vector<4x8x8xf32>
    %18 = arith.truncf %17 : vector<4x8x8xf32> to vector<4x8x8xbf16>
    %19 = vector.shape_cast %9 : vector<8x32xf32> to vector<8x4x8xf32>
    %20 = tpu.transpose %19, [1, 0, 2] : vector<8x4x8xf32> -> vector<4x8x8xf32>
    %21 = arith.truncf %20 : vector<4x8x8xf32> to vector<4x8x8xbf16>
    "tpu.trace_start"() <{level = 10 : i32, message = "hnd,hmd->hnm"}> : () -> ()
    %cst_12 = arith.constant dense<0.000000e+00> : vector<4x8x8xf32>
    %22 = tpu.matmul %15, %18, %cst_12 {dimension_numbers = #tpu.dot_dimension_numbers<[2], [2], [1], [1], [0, 0, 0, 1, 1, 1], [0], [0]>} : vector<4x8x8xbf16>, vector<4x8x8xbf16>, vector<4x8x8xf32> -> vector<4x8x8xf32>
    "tpu.trace_stop"() : () -> ()
    %cst_13 = arith.constant 0.353553385 : f32
    %23 = vector.broadcast %cst_13 : f32 to vector<4x8x8xf32>
    %24 = arith.mulf %22, %23 : vector<4x8x8xf32>
    %25 = vector.shape_cast %10 : vector<8x8xf32> to vector<1x8x8xf32>
    %26 = vector.broadcast %25 : vector<1x8x8xf32> to vector<4x8x8xf32>
    %27 = arith.addf %24, %26 : vector<4x8x8xf32>
    %cst_14 = arith.constant dense<0xFF800000> : vector<4x8xf32>
    %28 = vector.multi_reduction <maximumf>, %27, %cst_14 [2] : vector<4x8x8xf32> to vector<4x8xf32>
    %29 = vector.shape_cast %28 : vector<4x8xf32> to vector<4x8x1xf32>
    %30 = vector.broadcast %29 : vector<4x8x1xf32> to vector<4x8x8xf32>
    %31 = arith.subf %27, %30 : vector<4x8x8xf32>
    %32 = math.exp %31 : vector<4x8x8xf32>
    %cst_15 = arith.constant dense<0.000000e+00> : vector<4x8xf32>
    %33 = vector.multi_reduction <add>, %32, %cst_15 [2] : vector<4x8x8xf32> to vector<4x8xf32>
    %34 = vector.shape_cast %33 : vector<4x8xf32> to vector<4x8x1xf32>
    %35 = tpu.reciprocal %34 {approx = true} : vector<4x8x1xf32> -> vector<4x8x1xf32>
    %36 = vector.broadcast %35 : vector<4x8x1xf32> to vector<4x8x8xf32>
    %37 = arith.mulf %32, %36 : vector<4x8x8xf32>
    %38 = arith.truncf %37 : vector<4x8x8xf32> to vector<4x8x8xbf16>
    "tpu.trace_start"() <{level = 10 : i32, message = "hnm,hmd->hnd"}> : () -> ()
    %cst_16 = arith.constant dense<0.000000e+00> : vector<4x8x8xf32>
    %39 = tpu.matmul %38, %21, %cst_16 {dimension_numbers = #tpu.dot_dimension_numbers<[2], [1], [1], [2], [0, 0, 0, 1, 1, 2], [0], [0]>} : vector<4x8x8xbf16>, vector<4x8x8xbf16>, vector<4x8x8xf32> -> vector<4x8x8xf32>
    "tpu.trace_stop"() : () -> ()
    %40 = tpu.transpose %39, [1, 0, 2] : vector<4x8x8xf32> -> vector<8x4x8xf32>
    %41 = vector.shape_cast %40 : vector<8x4x8xf32> to vector<8x32xf32>
    %42 = arith.truncf %41 : vector<8x32xf32> to vector<8x32xbf16>
    %cst_17 = arith.constant dense<0.000000e+00> : vector<8x32xf32>
    %43 = tpu.matmul %42, %11, %cst_17 {dimension_numbers = #tpu.dot_dimension_numbers<[1], [0], [0], [1], [0, 0, 1, 1], [], []>} : vector<8x32xbf16>, vector<32x32xbf16>, vector<8x32xf32> -> vector<8x32xf32>
    %44 = vector.broadcast %12 : vector<1x32xf32> to vector<8x32xf32>
    %45 = arith.addf %43, %44 : vector<8x32xf32>
    %c0_18 = arith.constant 0 : index
    %c0_19 = arith.constant 0 : index
    %c0_20 = arith.constant 0 : index
    %46 = vector.load %arg7[%c0_18, %c0_19, %c0_20] : memref<1x8x32xf32, #tpu.memory_space<vmem>>, vector<1x8x32xf32>
    %47 = vector.shape_cast %46 : vector<1x8x32xf32> to vector<8x32xf32>
    %48 = vector.shape_cast %45 : vector<8x32xf32> to vector<1x8x32xf32>
    tpu.vector_store %arg7[%c0_18, %c0_19, %c0_20], %48 {strides = array<i32>} : memref<1x8x32xf32, #tpu.memory_space<vmem>>, vector<1x8x32xf32>,
    return
  }
  func.func @transform_0(%arg0: i32) -> (i32, i32) {
    %c0_i32 = arith.constant 0 : i32
    %c0_i32_0 = arith.constant 0 : i32
    %c0_i32_1 = arith.constant 0 : i32
    return %c0_i32, %c0_i32_0 : i32, i32
  }
  func.func @transform_1(%arg0: i32) -> (i32, i32, i32) {
    %c0_i32 = arith.constant 0 : i32
    %c0_i32_0 = arith.constant 0 : i32
    %c0_i32_1 = arith.constant 0 : i32
    return %arg0, %c0_i32, %c0_i32_0 : i32, i32, i32
  }
  func.func @transform_2(%arg0: i32) -> (i32, i32) {
    %c0_i32 = arith.constant 0 : i32
    %c0_i32_0 = arith.constant 0 : i32
    %c0_i32_1 = arith.constant 0 : i32
    return %c0_i32, %c0_i32_0 : i32, i32
  }
  func.func @transform_3(%arg0: i32) -> (i32, i32) {
    %c0_i32 = arith.constant 0 : i32
    %c0_i32_0 = arith.constant 0 : i32
    %c0_i32_1 = arith.constant 0 : i32
    return %c0_i32, %c0_i32_0 : i32, i32
  }
  func.func @transform_4(%arg0: i32) -> (i32, i32) {
    %c0_i32 = arith.constant 0 : i32
    %c0_i32_0 = arith.constant 0 : i32
    %c0_i32_1 = arith.constant 0 : i32
    return %c0_i32, %c0_i32_0 : i32, i32
  }
  func.func @transform_5(%arg0: i32) -> (i32, i32) {
    %c0_i32 = arith.constant 0 : i32
    %c0_i32_0 = arith.constant 0 : i32
    %c0_i32_1 = arith.constant 0 : i32
    return %c0_i32, %c0_i32_0 : i32, i32
  }
  func.func @transform_6(%arg0: i32) -> (i32, i32, i32) {
    %c0_i32 = arith.constant 0 : i32
    %c0_i32_0 = arith.constant 0 : i32
    %c0_i32_1 = arith.constant 0 : i32
    return %arg0, %c0_i32, %c0_i32_0 : i32, i32, i32
  }
}

module attributes {stable_mosaic.version = 11 : i64} {
  func.func @_mha_self_kernel(%arg0: i32, %arg1: memref<8x8xf32, #tpu.memory_space<vmem>>, %arg2: memref<1x8x32xbf16, #tpu.memory_space<vmem>>, %arg3: memref<32x96xbf16, #tpu.memory_space<vmem>>, %arg4: memref<1x96xf32, #tpu.memory_space<vmem>>, %arg5: memref<32x32xbf16, #tpu.memory_space<vmem>>, %arg6: memref<1x32xf32, #tpu.memory_space<vmem>>, %arg7: memref<1x8x32xf32, #tpu.memory_space<vmem>>) attributes {dimension_semantics = [#tpu.dimension_semantics<parallel>], iteration_bounds = array<i64: 2>, scalar_prefetch = 0 : i64, scratch_operands = 0 : i64, tpu.core_type = #tpu.core_type<tc>, window_params = [{pipeline_mode = #tpu.pipeline_mode<synchronous>, transform_indices = @transform_0, window_bounds = array<i64: 8, 8>}, {transform_indices = @transform_1, window_bounds = array<i64: 1, 8, 32>}, {pipeline_mode = #tpu.pipeline_mode<synchronous>, transform_indices = @transform_2, window_bounds = array<i64: 32, 96>}, {pipeline_mode = #tpu.pipeline_mode<synchronous>, transform_indices = @transform_3, window_bounds = array<i64: 1, 96>}, {pipeline_mode = #tpu.pipeline_mode<synchronous>, transform_indices = @transform_4, window_bounds = array<i64: 32, 32>}, {pipeline_mode = #tpu.pipeline_mode<synchronous>, transform_indices = @transform_5, window_bounds = array<i64: 1, 32>}, {transform_indices = @transform_6, window_bounds = array<i64: 1, 8, 32>}]} {
    %c0 = arith.constant 0 : index
    %c0_0 = arith.constant 0 : index
    %c0_1 = arith.constant 0 : index
    %0 = vector.load %arg2[%c0, %c0_0, %c0_1] : memref<1x8x32xbf16, #tpu.memory_space<vmem>>, vector<1x8x32xbf16>
    %1 = vector.shape_cast %0 : vector<1x8x32xbf16> to vector<8x32xbf16>
    %c0_2 = arith.constant 0 : index
    %c0_3 = arith.constant 0 : index
    %2 = vector.load %arg3[%c0_2, %c0_3] : memref<32x96xbf16, #tpu.memory_space<vmem>>, vector<32x96xbf16>
    %cst = arith.constant dense<0.000000e+00> : vector<8x96xf32>
    %3 = tpu.matmul %1, %2, %cst {dimension_numbers = #tpu.dot_dimension_numbers<[1], [0], [0], [1], [0, 0, 1, 1], [], []>} : vector<8x32xbf16>, vector<32x96xbf16>, vector<8x96xf32> -> vector<8x96xf32>
    %c0_4 = arith.constant 0 : index
    %c0_5 = arith.constant 0 : index
    %4 = vector.load %arg4[%c0_4, %c0_5] : memref<1x96xf32, #tpu.memory_space<vmem>>, vector<1x96xf32>
    %5 = vector.broadcast %4 : vector<1x96xf32> to vector<8x96xf32>
    %6 = arith.addf %3, %5 : vector<8x96xf32>
    %7 = vector.extract_strided_slice %6 {offsets = [0, 0], sizes = [8, 32], strides = [1, 1]} : vector<8x96xf32> to vector<8x32xf32>
    %8 = vector.extract_strided_slice %6 {offsets = [0, 32], sizes = [8, 32], strides = [1, 1]} : vector<8x96xf32> to vector<8x32xf32>
    %9 = vector.extract_strided_slice %6 {offsets = [0, 64], sizes = [8, 32], strides = [1, 1]} : vector<8x96xf32> to vector<8x32xf32>
    %c0_6 = arith.constant 0 : index
    %c0_7 = arith.constant 0 : index
    %10 = vector.load %arg1[%c0_6, %c0_7] : memref<8x8xf32, #tpu.memory_space<vmem>>, vector<8x8xf32>
    %c0_8 = arith.constant 0 : index
    %c0_9 = arith.constant 0 : index
    %11 = vector.load %arg5[%c0_8, %c0_9] : memref<32x32xbf16, #tpu.memory_space<vmem>>, vector<32x32xbf16>
    %c0_10 = arith.constant 0 : index
    %c0_11 = arith.constant 0 : index
    %12 = vector.load %arg6[%c0_10, %c0_11] : memref<1x32xf32, #tpu.memory_space<vmem>>, vector<1x32xf32>
    %13 = vector.shape_cast %7 : vector<8x32xf32> to vector<8x4x8xf32>
    %14 = tpu.transpose %13, [1, 0, 2] : vector<8x4x8xf32> -> vector<4x8x8xf32>
    %15 = arith.truncf %14 : vector<4x8x8xf32> to vector<4x8x8xbf16>
    %16 = vector.shape_cast %8 : vector<8x32xf32> to vector<8x4x8xf32>
    %17 = tpu.transpose %16, [1, 0, 2] : vector<8x4x8xf32> -> vector<4x8x8xf32>
    %18 = arith.truncf %17 : vector<4x8x8xf32> to vector<4x8x8xbf16>
    %19 = vector.shape_cast %9 : vector<8x32xf32> to vector<8x4x8xf32>
    %20 = tpu.transpose %19, [1, 0, 2] : vector<8x4x8xf32> -> vector<4x8x8xf32>
    %21 = arith.truncf %20 : vector<4x8x8xf32> to vector<4x8x8xbf16>
    "tpu.trace_start"() <{level = 10 : i32, message = "hnd,hmd->hnm"}> : () -> ()
    %cst_12 = arith.constant dense<0.000000e+00> : vector<4x8x8xf32>
    %22 = tpu.matmul %15, %18, %cst_12 {dimension_numbers = #tpu.dot_dimension_numbers<[2], [2], [1], [1], [0, 0, 0, 1, 1, 1], [0], [0]>} : vector<4x8x8xbf16>, vector<4x8x8xbf16>, vector<4x8x8xf32> -> vector<4x8x8xf32>
    "tpu.trace_stop"() : () -> ()
    %cst_13 = arith.constant 0.353553385 : f32
    %23 = vector.broadcast %cst_13 : f32 to vector<4x8x8xf32>
    %24 = arith.mulf %22, %23 : vector<4x8x8xf32>
    %25 = vector.shape_cast %10 : vector<8x8xf32> to vector<1x8x8xf32>
    %26 = vector.broadcast %25 : vector<1x8x8xf32> to vector<4x8x8xf32>
    %27 = arith.addf %24, %26 : vector<4x8x8xf32>
    %cst_14 = arith.constant dense<0xFF800000> : vector<4x8xf32>
    %28 = vector.multi_reduction <maximumf>, %27, %cst_14 [2] : vector<4x8x8xf32> to vector<4x8xf32>
    %29 = vector.shape_cast %28 : vector<4x8xf32> to vector<4x8x1xf32>
    %30 = vector.broadcast %29 : vector<4x8x1xf32> to vector<4x8x8xf32>
    %31 = arith.subf %27, %30 : vector<4x8x8xf32>
    %32 = math.exp %31 : vector<4x8x8xf32>
    %cst_15 = arith.constant dense<0.000000e+00> : vector<4x8xf32>
    %33 = vector.multi_reduction <add>, %32, %cst_15 [2] : vector<4x8x8xf32> to vector<4x8xf32>
    %34 = vector.shape_cast %33 : vector<4x8xf32> to vector<4x8x1xf32>
    %35 = tpu.reciprocal %34 {approx = true} : vector<4x8x1xf32> -> vector<4x8x1xf32>
    %36 = vector.broadcast %35 : vector<4x8x1xf32> to vector<4x8x8xf32>
    %37 = arith.mulf %32, %36 : vector<4x8x8xf32>
    %38 = arith.truncf %37 : vector<4x8x8xf32> to vector<4x8x8xbf16>
    "tpu.trace_start"() <{level = 10 : i32, message = "hnm,hmd->hnd"}> : () -> ()
    %cst_16 = arith.constant dense<0.000000e+00> : vector<4x8x8xf32>
    %39 = tpu.matmul %38, %21, %cst_16 {dimension_numbers = #tpu.dot_dimension_numbers<[2], [1], [1], [2], [0, 0, 0, 1, 1, 2], [0], [0]>} : vector<4x8x8xbf16>, vector<4x8x8xbf16>, vector<4x8x8xf32> -> vector<4x8x8xf32>
    "tpu.trace_stop"() : () -> ()
    %40 = tpu.transpose %39, [1, 0, 2] : vector<4x8x8xf32> -> vector<8x4x8xf32>
    %41 = vector.shape_cast %40 : vector<8x4x8xf32> to vector<8x32xf32>
    %42 = arith.truncf %41 : vector<8x32xf32> to vector<8x32xbf16>
    %cst_17 = arith.constant dense<0.000000e+00> : vector<8x32xf32>
    %43 = tpu.matmul %42, %11, %cst_17 {dimension_numbers = #tpu.dot_dimension_numbers<[1], [0], [0], [1], [0, 0, 1, 1], [], []>} : vector<8x32xbf16>, vector<32x32xbf16>, vector<8x32xf32> -> vector<8x32xf32>
    %44 = vector.broadcast %12 : vector<1x32xf32> to vector<8x32xf32>
    %45 = arith.addf %43, %44 : vector<8x32xf32>
    %c0_18 = arith.constant 0 : index
    %c0_19 = arith.constant 0 : index
    %c0_20 = arith.constant 0 : index
    %46 = vector.load %arg7[%c0_18, %c0_19, %c0_20] : memref<1x8x32xf32, #tpu.memory_space<vmem>>, vector<1x8x32xf32>
    %47 = vector.shape_cast %46 : vector<1x8x32xf32> to vector<8x32xf32>
    %48 = vector.shape_cast %45 : vector<8x32xf32> to vector<1x8x32xf32>
    tpu.vector_store %arg7[%c0_18, %c0_19, %c0_20], %48 {strides = array<i32>} : memref<1x8x32xf32, #tpu.memory_space<vmem>>, vector<1x8x32xf32>,
    return
  }
  func.func @transform_0(%arg0: i32) -> (i32, i32) {
    %c0_i32 = arith.constant 0 : i32
    %c0_i32_0 = arith.constant 0 : i32
    %c0_i32_1 = arith.constant 0 : i32
    return %c0_i32, %c0_i32_0 : i32, i32
  }
  func.func @transform_1(%arg0: i32) -> (i32, i32, i32) {
    %c0_i32 = arith.constant 0 : i32
    %c0_i32_0 = arith.constant 0 : i32
    %c0_i32_1 = arith.constant 0 : i32
    return %arg0, %c0_i32, %c0_i32_0 : i32, i32, i32
  }
  func.func @transform_2(%arg0: i32) -> (i32, i32) {
    %c0_i32 = arith.constant 0 : i32
    %c0_i32_0 = arith.constant 0 : i32
    %c0_i32_1 = arith.constant 0 : i32
    return %c0_i32, %c0_i32_0 : i32, i32
  }
  func.func @transform_3(%arg0: i32) -> (i32, i32) {
    %c0_i32 = arith.constant 0 : i32
    %c0_i32_0 = arith.constant 0 : i32
    %c0_i32_1 = arith.constant 0 : i32
    return %c0_i32, %c0_i32_0 : i32, i32
  }
  func.func @transform_4(%arg0: i32) -> (i32, i32) {
    %c0_i32 = arith.constant 0 : i32
    %c0_i32_0 = arith.constant 0 : i32
    %c0_i32_1 = arith.constant 0 : i32
    return %c0_i32, %c0_i32_0 : i32, i32
  }
  func.func @transform_5(%arg0: i32) -> (i32, i32) {
    %c0_i32 = arith.constant 0 : i32
    %c0_i32_0 = arith.constant 0 : i32
    %c0_i32_1 = arith.constant 0 : i32
    return %c0_i32, %c0_i32_0 : i32, i32
  }
  func.func @transform_6(%arg0: i32) -> (i32, i32, i32) {
    %c0_i32 = arith.constant 0 : i32
    %c0_i32_0 = arith.constant 0 : i32
    %c0_i32_1 = arith.constant 0 : i32
    return %arg0, %c0_i32, %c0_i32_0 : i32, i32, i32
  }
}

</mosaic_0001>

<bundles_post_ra>
// kernel: tpu_custom_call.1
= control target key start
LH: loop header
LB: loop body
LE: loop exit
PB: predicated region body
PF: predicated region fallthrough
CT: control target
= control target key end

     0   :  { %11 = vsyncpa [#allocation3], 0  ;;  %s2525_s0 = inlined_call_operand.hbm [shape: f32[8,8], index: 0, kind: input, shape index: {}]   ;;  %s2526_s1 = inlined_call_operand.hbm [shape: bf16[2,8,32], index: 1, kind: input, shape index: {}]   ;;  %s2527_s2 = inlined_call_operand.hbm [shape: bf16[32,96], index: 2, kind: input, shape index: {}]   ;;  %s2528_s3 = inlined_call_operand.vmem [shape: f32[1,96], index: 3, kind: input, shape index: {}]   ;;  %s2529_s4 = inlined_call_operand.hbm [shape: bf16[32,32], index: 4, kind: input, shape index: {}]   ;;  %s2530_s5 = inlined_call_operand.vmem [shape: f32[1,32], index: 5, kind: input, shape index: {}]   ;;  %s2531_s6 = inlined_call_operand.hbm [shape: f32[2,8,32], index: 6, kind: output, shape index: {}]  }
   0x1   :  { %12 = vsyncpa [#allocation6], 0 }
   0x2   :  { %14 = vsyncpa [#allocation6 + $0x1], 0 }
   0x3   :  { %15 = vsyncpa [#allocation9], 0 }
   0x4   :  { %16 = vsyncpa [#allocation4], 0 }
   0x5   :  { %18 = vsyncpa [#allocation4 + $0x1], 0  ;;  %s2082_s21 = smov 0   ;;  %s2084_s22 = smov 0  }
   0x6   :  { %s2086_s23 = smov 0   ;;  %s2088_s24 = smov 0  }
   0x7 LB: > { %s2103_s25 = sadd.s32 4294967295, %s2026_s24   ;;  %s1595_s26 = sadd.s32 4294967294, %s2026_s24   ;;  %s2026_s24 = sphi %s2088_s24, %s2556_s24   ;;  %s2022_s23 = sphi %s2086_s23, %s2555_s23   ;;  %s2018_s22 = sphi %s2084_s22, %s2554_s22   ;;  %s2014_s21 = sphi %s2082_s21, %s2553_s21  }
   0x8   : > { %p65_p0 = scmp.ne.s32.totalorder %s2018_s22, %s2014_s21  ;;  %p2532_p1 = scmp.eq.s32.totalorder %s2103_s25, 0 }
   0x9   : > { %p179_p3 = scmp.eq.s32.totalorder %s1595_s26, 1  ;;  %p1596_p5 = scmp.ge.s32.totalorder %s2026_s24, 1 }
   0xa   : > { %p2112_p4 = por %p2532_p1, %p65_p0  ;;  %p186_p7 = scmp.lt.s32.totalorder %s2026_s24, 3 }
   0xb   : > { %p2117_p6 = por %p179_p3, %p65_p0  ;;  %s2028_s30 = smov [#allocation7]  }
   0xc   : > { %s2535_s27 = scalar_select %p2112_p4, 1, 0 }
   0xd   : > { %s2536_s28 = scalar_select %p2117_p6, 1, 0 }
   0xe   : > { %p2122_p8 = pnand %p1596_p5, %p186_p7  ;;  %s209_s7 = sshll.u32 %s2028_s30, 4  ;;  %s2126_s7 = int_to_ptr.vmem [resolvable:$true] %s209_s7 }
   0xf   : > { %s2029_s9 = smov [#allocation2]   ;;  %s2030_s11 = smov [#allocation8]  }
  0x10   : > { %s2537_s29 = scalar_select %p2122_p8, 1, 0 }
  0x11   : > { %p1739_p9 = pneg %p2122_p8  ;;  %s199_s10 = sshll.u32 %s2029_s9, 4  ;;  %s2137_s10 = int_to_ptr.vmem [resolvable:$true] %s199_s10 }
  0x12   : > { %s2139_s12 = sshll.u32 %s2030_s11, 4  ;;  %s1834_s15 = scalar_lea.hbm %s2527_s2, 256  ;;  %s226_s12 = int_to_ptr.vmem [resolvable:$true] %s2139_s12 }
  0x13   : > { %p2133_p11 = pnand %p1739_p9, %p2532_p1  ;;  %p1835_p12 = scmp.ne.s32.totalorder %s2527_s2, %s1834_s15 }
  0x14   : > { %p1841_p5 = scmp.lt.u32.totalorder %s1834_s15, %s2527_s2 }
  0x15   : > { %p2149_p13 = pneg %p2133_p11 }
  0x17   : > { %p1837_p0 = pnand %p2149_p13, %p1835_p12 }
  0x19   : > { %p1838_p3 = pneg %p1837_p0 }
  0x1b   : > { %p1843_p7 = pnand %p1841_p5, %p1838_p3 }
  0x1d   : > { %1846 = shalt.err (!%p1843_p7)
}
  0x1e   : > { %s1847_s26 = scalar_lea.vmem %s2126_s7, 256  ;;  %p1855_p2 = scmp.lt.s32.totalorder %s2126_s7, %s2126_s7 }
  0x1f   : > { %p1848_p9 = scmp.ne.s32.totalorder %s2126_s7, %s1847_s26  ;;  %p1856_p6 = scmp.lt.s32.totalorder %s1847_s26, %s1847_s26 }
  0x21   : > { %p1850_p10 = pnand %p1848_p9, %p2149_p13  ;;  %p1857_p12 = por %p1856_p6, %p1855_p2 }
  0x23   : > { %p1851_p1 = pneg %p1850_p10 }
  0x25   : > { %p1858_p0 = pnand %p1857_p12, %p1851_p1 }
  0x27   : > { %1861 = shalt.err (!%p1858_p0)
}
  0x28   : > { %s2031_s30 = smov 64   ;;  %s2032_s9 = smov 4  }
  0x29   : > { %1745 = dma.hbm_to_vmem [thread:$0]  (!%p2133_p11), %s2527_s2, 256, %s2126_s7, [#allocation6], %s2031_s30, %s2031_s30, %s2032_s9  }
  0x2a   : > { %s1862_s16 = scalar_lea.hbm %s2525_s0, 128 }
  0x2b   : > { %p1863_p1 = scmp.ne.s32.totalorder %s2525_s0, %s1862_s16  ;;  %p1869_p10 = scmp.lt.u32.totalorder %s1862_s16, %s2525_s0 }
  0x2d   : > { %p1865_p2 = pnand %p1863_p1, %p2149_p13 }
  0x2f   : > { %p1866_p6 = pneg %p1865_p2 }
  0x31   : > { %p1871_p3 = pnand %p1869_p10, %p1866_p6 }
  0x33   : > { %1874 = shalt.err (!%p1871_p3)
}
  0x34   : > { %s1875_s7 = scalar_lea.vmem %s2137_s10, 128  ;;  %p1883_p12 = scmp.lt.s32.totalorder %s2137_s10, %s2137_s10 }
  0x35   : > { %p1876_p5 = scmp.ne.s32.totalorder %s2137_s10, %s1875_s7  ;;  %p1884_p0 = scmp.lt.s32.totalorder %s1875_s7, %s1875_s7 }
  0x37   : > { %p1878_p7 = pnand %p1876_p5, %p2149_p13  ;;  %p1885_p1 = por %p1884_p0, %p1883_p12 }
  0x39   : > { %p1879_p9 = pneg %p1878_p7 }
  0x3b   : > { %p1886_p2 = pnand %p1885_p1, %p1879_p9 }
  0x3d   : > { %1889 = shalt.err (!%p1886_p2)
}
  0x3e   : > { %1742 = dma.hbm_to_vmem [thread:$0]  (!%p2133_p11), %s2525_s0, 128, %s2137_s10, [#allocation3]  }
  0x3f   : > { %s1890_s16 = scalar_lea.hbm %s2529_s4, 256 }
  0x40   : > { %p1891_p6 = scmp.ne.s32.totalorder %s2529_s4, %s1890_s16  ;;  %p1897_p5 = scmp.lt.u32.totalorder %s1890_s16, %s2529_s4 }
  0x42   : > { %p1893_p10 = pnand %p1891_p6, %p2149_p13 }
  0x44   : > { %p1894_p3 = pneg %p1893_p10 }
  0x46   : > { %p1899_p7 = pnand %p1897_p5, %p1894_p3 }
  0x48   : > { %1902 = shalt.err (!%p1899_p7)
}
  0x49   : > { %s1903_s7 = scalar_lea.vmem %s226_s12, 256  ;;  %p1911_p1 = scmp.lt.s32.totalorder %s226_s12, %s226_s12 }
  0x4a   : > { %p1904_p9 = scmp.ne.s32.totalorder %s226_s12, %s1903_s7  ;;  %p1912_p2 = scmp.lt.s32.totalorder %s1903_s7, %s1903_s7 }
  0x4c   : > { %p1906_p12 = pnand %p1904_p9, %p2149_p13  ;;  %p1913_p4 = por %p1912_p2, %p1911_p1 }
  0x4e   : > { %p1907_p0 = pneg %p1906_p12 }
  0x50   : > { %p1914_p8 = pnand %p1913_p4, %p1907_p0 }
  0x52   : > { %1917 = shalt.err (!%p1914_p8)
}
  0x53   : > { %1748 = dma.hbm_to_vmem [thread:$0]  (!%p2133_p11), %s2529_s4, 256, %s226_s12, [#allocation9], %s2031_s30, %s2031_s30, %s2032_s9  }
  0x54   : > { %s2219_s8 = sadd.s32 1, %s2026_s24   ;;  %s52_s13 = sadd.s32 1, %s2022_s23 }
  0x55   : > { %s49_s18 = ssub.s32 %s2026_s24, %s2219_s8  ;;  %p59_p8 = scmp.ne.s32.totalorder %s2022_s23, %s2018_s22 }
  0x56   : > { %p50_p4 = scmp.eq.s32.totalorder %s49_s18, 0  ;;  %p60_p13 = scmp.eq.s32.totalorder %s2026_s24, 0 }
  0x57   : > { %p1760_p6 = scmp.lt.s32.totalorder %s2026_s24, 2  ;;  %p2540_p3 = scmp.eq.s32.totalorder %s2103_s25, 1 }
  0x58   : > { %s2229_s14 = scalar_select %p50_p4, %s2022_s23, %s52_s13  }
  0x59   : > { %p61_p10 = por %p60_p13, %p59_p8  ;;  %p2233_p5 = por %p2540_p3, %p59_p8 }
  0x5a   : > { %s242_s16 = sand.u32 1, %s2026_s24   ;;  %s244_s17 = sand.u32 1, %s2022_s23  }
  0x5b   : > { %s1601_s12 = sshll.u32 %s244_s17, 2  ;;  %s1602_s30 = sshll.u32 %s2026_s24, 6 }
  0x5c   : > { %s2243_s20 = scalar_lea.hbm %s2526_s1, %s1602_s30  ;;  %s246_s26 = scalar_lea.vmem [#allocation5], %s1601_s12 }
  0x5d   : > { %s253_s7 = sshll.u32 %s246_s26, 4  ;;  %p2247_p11 = pnand %p1760_p6, %p61_p10  ;;  %s2245_s7 = int_to_ptr.vmem [resolvable:$true] %s253_s7 }
  0x5e   : > { %s243_s11 = scalar_lea.sflag [#allocation6], %s242_s16  ;;  %s1918_s18 = scalar_lea.hbm %s2243_s20, 64 }
  0x5f   : > { %p1919_p7 = scmp.ne.s32.totalorder %s2243_s20, %s1918_s18  ;;  %p1920_p9 = pneg %p2247_p11 }
  0x60   : > { %s1923_s12 = scalar_lea.hbm %s2526_s1, 128  ;;  %p1924_p1 = scmp.lt.u32.totalorder %s2243_s20, %s2526_s1 }
  0x61   : > { %p1921_p12 = pnand %p1920_p9, %p1919_p7  ;;  %p1925_p2 = scmp.lt.u32.totalorder %s1923_s12, %s1918_s18 }
  0x62   : > { %p1927_p8 = scmp.lt.u32.totalorder %s1918_s18, %s2243_s20 }
  0x63   : > { %p1922_p0 = pneg %p1921_p12  ;;  %p1926_p4 = por %p1925_p2, %p1924_p1 }
  0x65   : > { %p1928_p13 = por %p1927_p8, %p1926_p4 }
  0x67   : > { %p1929_p6 = pnand %p1928_p13, %p1922_p0 }
  0x69   : > { %1932 = shalt.err (!%p1929_p6)
}
  0x6a   : > { %s1933_s16 = scalar_lea.vmem %s2245_s7, 64  ;;  %s2033_s19 = smov [#allocation5]  }
  0x6b   : > { %p1934_p10 = scmp.ne.s32.totalorder %s2245_s7, %s1933_s16  ;;  %s1938_s26 = sshll.u32 %s2033_s19, 4  ;;  %s1939_s26 = int_to_ptr.vmem [resolvable:$false] %s1938_s26 }
  0x6c   : > { %s1940_s13 = scalar_lea.vmem %s1939_s26, 128  ;;  %p1941_p12 = scmp.lt.s32.totalorder %s2245_s7, %s1939_s26 }
  0x6d   : > { %p1936_p3 = pnand %p1934_p10, %p1920_p9  ;;  %p1942_p1 = scmp.lt.s32.totalorder %s1940_s13, %s1933_s16 }
  0x6f   : > { %p1937_p7 = pneg %p1936_p3  ;;  %p1943_p2 = por %p1942_p1, %p1941_p12 }
  0x71   : > { %p1944_p4 = pnand %p1943_p2, %p1937_p7 }
  0x73   : > { %1947 = shalt.err (!%p1944_p4)
}
  0x74   : > { %1752 = dma.hbm_to_vmem [thread:$0]  (!%p2247_p11), %s2243_s20, 64, %s2245_s7, %s243_s11  }
  0x75   : > { %p2543_p0 = scmp.ne.s32.totalorder %s2537_s29, 0 }
  0x76   : > { %p2544_p9 = scmp.eq.s32.totalorder (!%p2543_p0), %s2103_s25, 0 }
  0x77   : > { %262 = sbr.rel (%p2543_p0) target bundleno = 1790 (0x6fe), region = 44 }
  0x7e   : > { %1993 = dma.done.wait (%p2544_p9), [#allocation3], 128   ;;  %p2545_p8 = pmov %p2544_p9 }
  0x7f   : > { %s268_s18 = sand.u32 1, %s2103_s25   ;;  %s2284_s17 = sand.u32 1, %s2018_s22  }
  0x80   : > { %1995 = vsyncadd (%p2545_p8), [#allocation3], 4294967168  ;;  %s1605_s10 = sshll.u32 %s2284_s17, 2  ;;  %s269_s12 = scalar_lea.sflag [#allocation6], %s268_s18 }
  0x81   : > { %s272_s30 = scalar_lea.vmem [#allocation5], %s1605_s10  ;;  %p2546_p11 = scmp.ne.s32.totalorder %s2535_s27, 0 }
  0x83   : > { %1997 = dma.done.wait (%p2546_p11), %s269_s12, 64  }
  0x84   : > { %1999 = vsyncadd (%p2546_p11), %s269_s12, 4294967232  ;;  %p2547_p13 = pmov %p2545_p8 }
  0x85   : > { %p2548_p6 = pmov %p2545_p8 }
  0x86   : > { %2001 = dma.done.wait (%p2547_p13), [#allocation6], 256  }
  0x87   : > { %2003 = vsyncadd (%p2548_p6), [#allocation6], 4294967040  ;;  %p2549_p10 = pmov %p2548_p6 }
  0x88   : > { %p2550_p3 = pmov %p2548_p6 }
  0x89   : > { %2005 = dma.done.wait (%p2549_p10), [#allocation9], 256  }
  0x8a   : > { %2007 = vsyncadd (%p2550_p3), [#allocation9], 4294967040  ;;  %v2034_v0 = vmov 0.0   ;;  %vm2035_vm0 = vmmov 0   ;;  %v1814_v1 = vld [vmem:[#allocation7] sm:$0xff]   ;;  %v1815_v2 = vld [vmem:[#allocation7 + $0x8] sm:$0xff]   ;;  %v399_v15 = vlaneseq }
  0x8b   : > { %1659 = vmatprep.subr.bf16.mxu0 %v2034_v0  ;;  %1663 = vmatprep.mubr.msk.bf16.mxu0 %vm2035_vm0, %v2034_v0  ;;  %v310_v3 = vld [vmem:[%s272_s30] sm:$0xf]  ;;  %vm334_vm1 = vcmask 261120   ;;  %v1609_v4 = vld [vmem:[%s2528_s3] ss:$0 sm:$0xff]  ;;  %s2036_s20 = smov 104  }
  0x8c   : > { %1667 = vmatprep.subr.bf16.mxu1 %v2034_v0  ;;  %1669 = vmatprep.mubr.msk.bf16.mxu1 %vm2035_vm0, %v2034_v0  ;;  %s2037_s7 = smov 120   ;;  %s2038_s11 = smov 96   ;;  %v2040_v13 = vmov 1983009808   ;;  %v400_v17 = vshrl.u32 %v399_v15, 7  ;;  %vm838_vm2 = vcmask 64512  }
  0x8d   : > { %1660 = vmatpush3.bf16.msra.mxu0 %v1814_v1  ;;  %s2039_s9 = smov 112   ;;  %v397_v14 = vunpack.c.l.s4 %v2040_v13  ;;  %v2041_v18 = vmov 1934713408   ;;  %s2042_s16 = smov 64   ;;  %vm1082_vm3 = vcmask 1043456   ;;  %vm1413_vm4 = vcmask 130048  }
  0x8e   : > { %1661 = vmatprep.subr.bf16.mxu0 %v2034_v0  ;;  %v429_v19 = vunpack.c.l.s4 %v2041_v18  ;;  %s2043_s19 = smov 16   ;;  %s2044_s26 = smov 8   ;;  %vm1415_vm5 = vcmask 195584  }
  0x8f   : > { %v398_v16 = vunpack.c.0.s8 %v397_v14  ;;  %s2045_s13 = smov 24   ;;  %s1608_s18 = sshll.u32 %s2284_s17, 3 }
  0x90   : > { %v430_v25 = vunpack.c.0.s8 %v429_v19  ;;  %s1634_s30 = sshll.u32 %s2103_s25, 7  ;;  %s308_s27 = scalar_lea.vmem [#allocation10], %s1608_s18 }
  0x91   : > { %1662 = vmatpush3.bf16.msra.mxu0 %v1815_v2  ;;  %v2332_v22 = vsub.s32 %v398_v16, %v400_v17  ;;  %s1494_s29 = sshll.u32 %s308_s27, 4  ;;  %s1481_s25 = scalar_lea.sflag [#allocation4], %s2284_s17  ;;  %s2482_s29 = int_to_ptr.vmem [resolvable:$true] %s1494_s29 }
  0x92   : > { %1673 = vmatprep.subr.bf16.mxu0 %v2034_v0  ;;  %v2342_v32 = vsub.s32 %v430_v25, %v400_v17 }
  0x94   : > { %1664 = vmatmul.mubr.msk.bf16.vlgmr.msra.gmra.mrb[0].mxu0 %vm334_vm1, %v310_v3 }
  0x95   : > { %1675 = vmatprep.mubr.msk.bf16.mxu0 %vm2035_vm0, %v2034_v0 }
 0x167   : > { %v372_v5 = vpop.f32.mrb[0].mxu0 }
 0x168   : > { %v2313_v6 = vadd.f32 %v1609_v4, %v372_v5  ;;  %v1665_v7 = vpop.f32.mrb[1].mxu0 }
 0x169   : > { %v375_v8 = vpop.f32.mrb[2].mxu0 }
 0x16a   : > { %391 = vrot.lane.b32.xlu1 %v2313_v6, %s2036_s20  ;;  %385 = vrot.lane.b32.xlu0 %v2313_v6, %s2037_s7  ;;  %v1666_v9 = vpop.f32.mrb[3].mxu0 }
 0x16e   : > { %534 = vrot.lane.b32.xlu1 %v2313_v6, %s2038_s11  ;;  %388 = vrot.lane.b32.xlu0 %v2313_v6, %s2039_s9  ;;  %s1948_s9 = scalar_lea.vmem %s2482_s29, 128 }
 0x16f   : > { %p1949_p7 = scmp.ne.s32.totalorder %s2482_s29, %s1948_s9 }
 0x171   : > { %p1950_p12 = pnand %p1949_p7, %p2233_p5 }
 0x173   : > { %p1951_p1 = pneg %p1950_p12 }
 0x1dc   : > { %v2319_v10 = vpop.permute.xlu0 %385  ;;  %v2322_v11 = vpop.permute.xlu1 %391 }
 0x1dd   : > { %536 = vrot.lane.b32.xlu0 %v2319_v10, %s2038_s11  ;;  %v410_v23 = vcombine.low %v2319_v10, %v2322_v11  ;;  %v411_v24 = vcombine.high %v2319_v10, %v2322_v11 }
 0x1df   : > { %v418_v28 = vrot.slane %v410_v23, %v2332_v22  ;;  %v425_v29 = vrot.slane %v411_v24, %v2332_v22 }
 0x1e0   : > { %v2324_v12 = vpop.permute.xlu0 %388  ;;  %v535_v30 = vpop.permute.xlu1 %534 }
 0x1e1   : > { %540 = vrot.lane.b32.xlu0 %v2322_v11, %s2038_s11  ;;  %538 = vrot.lane.b32.xlu1 %v2324_v12, %s2038_s11  ;;  %v394_v20 = vcombine.low %v2313_v6, %v2324_v12  ;;  %v395_v21 = vcombine.high %v2313_v6, %v2324_v12  ;;  %s2480_s11 = scalar_lea.hbm %s2531_s6, %s1634_s30 }
 0x1e3   : > { %v402_v26 = vrot.slane %v394_v20, %v2332_v22  ;;  %v409_v27 = vrot.slane %v395_v21, %v2332_v22 }
 0x1e5   : > { %v426_v33 = vcombine.low %v402_v26, %v418_v28  ;;  %v427_v34 = vcombine.high %v402_v26, %v418_v28  ;;  %v442_v35 = vcombine.low %v409_v27, %v425_v29  ;;  %v443_v36 = vcombine.high %v409_v27, %v425_v29 }
 0x1e7   : > { %v434_v43 = vrot.slane %v426_v33, %v2342_v32  ;;  %v441_v44 = vrot.slane %v427_v34, %v2342_v32  ;;  %v450_v45 = vrot.slane %v442_v35, %v2342_v32  ;;  %v457_v46 = vrot.slane %v443_v36, %v2342_v32 }
 0x1e9   : > { %v462_v55 = vcombine.low %v434_v43, %v441_v44  ;;  %v1613_v56 = vcombine.high %v434_v43, %v441_v44  ;;  %v478_v57 = vcombine.low %v450_v45, %v457_v46  ;;  %v1614_v58 = vcombine.high %v450_v45, %v457_v46 }
 0x1eb   : > { %v469_v4 = vrot.slane %v462_v55, %v2332_v22  ;;  %v477_v5 = vrot.slane %v1613_v56, %v2332_v22  ;;  %v485_v7 = vrot.slane %v478_v57, %v2332_v22  ;;  %v493_v8 = vrot.slane %v1614_v58, %v2332_v22  ;;  %v378_v56 = vld [vmem:[#allocation2] sm:$0xff] }
 0x1ed   : > { %v494_v23 = vcombine.low %v469_v4, %v477_v5  ;;  %v510_v24 = vcombine.low %v485_v7, %v493_v8 }
 0x1ef   : > { %v518_v33 = vrot.slane %v510_v24, %v2342_v32 }
 0x24f   : > { %v537_v31 = vpop.permute.xlu0 %536 }
 0x253   : > { %v539_v37 = vpop.permute.xlu1 %538  ;;  %v541_v38 = vpop.permute.xlu0 %540 }
 0x254   : > { %v546_v39 = vcombine.low %v535_v30, %v539_v37  ;;  %v547_v40 = vcombine.high %v535_v30, %v539_v37  ;;  %v562_v41 = vcombine.low %v537_v31, %v541_v38  ;;  %v563_v42 = vcombine.high %v537_v31, %v541_v38 }
 0x255   : > { %v502_v31 = vrot.slane %v494_v23, %v2342_v32  ;;  %v495_v38 = vcombine.high %v469_v4, %v477_v5 }
 0x256   : > { %v554_v47 = vrot.slane %v546_v39, %v2332_v22  ;;  %v561_v48 = vrot.slane %v547_v40, %v2332_v22  ;;  %v570_v49 = vrot.slane %v562_v41, %v2332_v22  ;;  %v577_v50 = vrot.slane %v563_v42, %v2332_v22 }
 0x257   : > { %v511_v39 = vcombine.high %v485_v7, %v493_v8  ;;  %v526_v40 = vcombine.low %v502_v31, %v518_v33  ;;  %v527_v41 = vcombine.high %v502_v31, %v518_v33  ;;  %v509_v46 = vrot.slane %v495_v38, %v2342_v32 }
 0x258   : > { %v578_v51 = vcombine.low %v554_v47, %v570_v49  ;;  %v579_v52 = vcombine.high %v554_v47, %v570_v49  ;;  %v594_v53 = vcombine.low %v561_v48, %v577_v50  ;;  %v595_v54 = vcombine.high %v561_v48, %v577_v50 }
 0x259   : > { %v530_v44 = vpack.c.bf16 %v526_v40, %v526_v40  ;;  %v531_v45 = vpack.c.bf16 %v527_v41, %v527_v41  ;;  %v525_v47 = vrot.slane %v511_v39, %v2342_v32 }
 0x25a   : > { %v586_v59 = vrot.slane %v578_v51, %v2342_v32  ;;  %v593_v60 = vrot.slane %v579_v52, %v2342_v32  ;;  %v602_v61 = vrot.slane %v594_v53, %v2342_v32  ;;  %v609_v62 = vrot.slane %v595_v54, %v2342_v32 }
 0x25b   : > { %v528_v50 = vcombine.low %v509_v46, %v525_v47  ;;  %v529_v51 = vcombine.high %v509_v46, %v525_v47 }
 0x25c   : > { %v614_v63 = vcombine.low %v586_v59, %v593_v60  ;;  %v1615_v1 = vcombine.high %v586_v59, %v593_v60  ;;  %v630_v2 = vcombine.low %v602_v61, %v609_v62  ;;  %v1616_v3 = vcombine.high %v602_v61, %v609_v62 }
 0x25d   : > { %v532_v52 = vpack.c.bf16 %v528_v50, %v528_v50  ;;  %v533_v53 = vpack.c.bf16 %v529_v51, %v529_v51 }
 0x25e   : > { %v621_v9 = vrot.slane %v614_v63, %v2332_v22  ;;  %v629_v13 = vrot.slane %v1615_v1, %v2332_v22  ;;  %v637_v14 = vrot.slane %v630_v2, %v2332_v22  ;;  %v645_v15 = vrot.slane %v1616_v3, %v2332_v22 }
 0x260   : > { %v646_v16 = vcombine.low %v621_v9, %v629_v13  ;;  %v662_v17 = vcombine.low %v637_v14, %v645_v15  ;;  %v647_v18 = vcombine.high %v621_v9, %v629_v13  ;;  %v663_v19 = vcombine.high %v637_v14, %v645_v15 }
 0x262   : > { %v654_v20 = vrot.slane %v646_v16, %v2342_v32  ;;  %v670_v21 = vrot.slane %v662_v17, %v2342_v32  ;;  %v661_v27 = vrot.slane %v647_v18, %v2342_v32  ;;  %v677_v28 = vrot.slane %v663_v19, %v2342_v32 }
 0x264   : > { %v678_v25 = vcombine.low %v654_v20, %v670_v21  ;;  %v679_v26 = vcombine.high %v654_v20, %v670_v21  ;;  %v680_v36 = vcombine.low %v661_v27, %v677_v28  ;;  %v681_v37 = vcombine.high %v661_v27, %v677_v28 }
 0x266   : > { %v682_v29 = vpack.c.bf16 %v678_v25, %v678_v25  ;;  %v683_v30 = vpack.c.bf16 %v679_v26, %v679_v26  ;;  %v684_v42 = vpack.c.bf16 %v680_v36, %v680_v36  ;;  %v685_v43 = vpack.c.bf16 %v681_v37, %v681_v37 }
 0x268   : > { %v843_v34 = vsel %vm838_vm2, %v682_v29, 0  ;;  %v889_v35 = vsel %vm838_vm2, %v683_v30, 0  ;;  %v935_v48 = vsel %vm838_vm2, %v684_v42, 0  ;;  %v981_v49 = vsel %vm838_vm2, %v685_v43, 0 }
 0x269   : > { %1668 = vmatpush3.bf16.xpose.msra.mxu1 %v843_v34  ;;  %1674 = vmatpush3.bf16.xpose.msra.mxu0 %v889_v35 }
 0x26a   : > { %1679 = vmatprep.subr.bf16.mxu1 %v2034_v0  ;;  %1685 = vmatprep.subr.bf16.mxu0 %v2034_v0 }
 0x270   : > { %1670 = vmatmul.mubr.msk.bf16.vlgmr.msra.gmra.mrb[0].mxu1 %vm838_vm2, %v530_v44  ;;  %1676 = vmatmul.mubr.msk.bf16.vlgmr.msra.gmra.mrb[4].mxu0 %vm838_vm2, %v531_v45 }
 0x271   : > { %1680 = vmatpush3.bf16.xpose.msra.mxu1 %v935_v48  ;;  %1686 = vmatpush3.bf16.xpose.msra.mxu0 %v981_v49 }
 0x272   : > { %1681 = vmatprep.mubr.msk.bf16.mxu1 %vm2035_vm0, %v2034_v0  ;;  %1687 = vmatprep.mubr.msk.bf16.mxu0 %vm2035_vm0, %v2034_v0 }
 0x273   : > { %1691 = vmatprep.subr.bf16.mxu1 %v2034_v0  ;;  %1697 = vmatprep.subr.bf16.mxu0 %v2034_v0 }
 0x278   : > { %1682 = vmatmul.mubr.msk.bf16.vlgmr.msra.gmra.mrb[4].mxu1 %vm838_vm2, %v532_v52  ;;  %1688 = vmatmul.mubr.msk.bf16.vlgmr.msra.gmra.mrb[8].mxu0 %vm838_vm2, %v533_v53 }
 0x279   : > { %1693 = vmatprep.mubr.msk.bf16.mxu1 %vm2035_vm0, %v2034_v0  ;;  %1699 = vmatprep.mubr.msk.bf16.mxu0 %vm2035_vm0, %v2034_v0 }
 0x343   : > { %v879_v54 = vpop.f32.mrb[0].mxu1  ;;  %v925_v55 = vpop.f32.mrb[4].mxu0 }
 0x344   : > { %v1023_v57 = vmul.f32 0.35355338, %v879_v54  ;;  %v1024_v58 = vmul.f32 0.35355338, %v925_v55  ;;  %v1671_v59 = vpop.f32.mrb[1].mxu1  ;;  %v1677_v60 = vpop.f32.mrb[5].mxu0 }
 0x345   : > { %v882_v61 = vpop.f32.mrb[2].mxu1  ;;  %v928_v62 = vpop.f32.mrb[6].mxu0 }
 0x346   : > { %v1672_v63 = vpop.f32.mrb[3].mxu1  ;;  %v1678_v1 = vpop.f32.mrb[7].mxu0  ;;  %v1027_v2 = vadd.f32 %v1023_v57, %v378_v56  ;;  %v1028_v3 = vadd.f32 %v1024_v58, %v378_v56 }
 0x348   : > { %v1031_v4 = vsel %vm838_vm2, %v1027_v2, -inf  ;;  %v1034_v5 = vsel %vm838_vm2, %v1028_v3, -inf }
 0x349   : > { %1032 = vmax.xlane.f32.xlu1 %v1031_v4  ;;  %1035 = vmax.xlane.f32.xlu0 %v1034_v5 }
 0x34b   : > { %v971_v7 = vpop.f32.mrb[4].mxu1  ;;  %v1017_v8 = vpop.f32.mrb[8].mxu0 }
 0x34c   : > { %v1025_v9 = vmul.f32 0.35355338, %v971_v7  ;;  %v1026_v13 = vmul.f32 0.35355338, %v1017_v8  ;;  %v1683_v14 = vpop.f32.mrb[5].mxu1  ;;  %v1689_v15 = vpop.f32.mrb[9].mxu0 }
 0x34d   : > { %v974_v16 = vpop.f32.mrb[6].mxu1  ;;  %v1020_v17 = vpop.f32.mrb[10].mxu0 }
 0x34e   : > { %v1684_v18 = vpop.f32.mrb[7].mxu1  ;;  %v1690_v19 = vpop.f32.mrb[11].mxu0  ;;  %v1029_v20 = vadd.f32 %v1025_v9, %v378_v56  ;;  %v1030_v21 = vadd.f32 %v1026_v13, %v378_v56 }
 0x350   : > { %v1037_v23 = vsel %vm838_vm2, %v1029_v20, -inf  ;;  %v1040_v24 = vsel %vm838_vm2, %v1030_v21, -inf }
 0x351   : > { %1038 = vmax.xlane.f32.xlu0 %v1037_v23  ;;  %1041 = vmax.xlane.f32.xlu1 %v1040_v24 }
 0x362   : > { %688 = vrot.lane.b32.xlu1 %v2319_v10, %s2042_s16 }
 0x367   : > { %686 = vrot.lane.b32.xlu0 %v2313_v6, %s2042_s16 }
 0x3d6   : > { %v1033_v25 = vpop.xlane.xlu1 %1032  ;;  %v1036_v26 = vpop.xlane.xlu0 %1035 }
 0x3d7   : > { %v1043_v27 = vsub.f32 %v1027_v2, %v1033_v25  ;;  %v1044_v28 = vsub.f32 %v1028_v3, %v1036_v26 }
 0x3d9   : > { %v1047_v29 = vmul.f32 1.442695, %v1043_v27  ;;  %v1049_v30 = vmul.f32 1.442695, %v1044_v28 }
 0x3db   : > { %1818 = vpow2.f32 %v1047_v29 }
 0x3dc   : > { %1820 = vpow2.f32 %v1049_v30 }
 0x3de   : > { %v1042_v6 = vpop.xlane.xlu1 %1041  ;;  %v1039_v35 = vpop.xlane.xlu0 %1038 }
 0x3df   : > { %v1046_v36 = vsub.f32 %v1030_v21, %v1042_v6  ;;  %v1045_v37 = vsub.f32 %v1029_v20, %v1039_v35 }
 0x3e1   : > { %v1053_v38 = vmul.f32 1.442695, %v1046_v36  ;;  %v1051_v39 = vmul.f32 1.442695, %v1045_v37 }
 0x3e2   : > { %v689_v43 = vpop.permute.xlu1 %688 }
 0x3e3   : > { %1822 = vpow2.f32 %v1053_v38 }
 0x3e4   : > { %1824 = vpow2.f32 %v1051_v39 }
 0x3e5   : > { %v2398_v31 = vpop.eup %1818 }
 0x3e6   : > { %v2400_v33 = vpop.eup %1820  ;;  %v1055_v34 = vsel %vm838_vm2, %v2398_v31, 0.0 }
 0x3e7   : > { %1056 = vadd.xlane.f32.xlu0 %v1055_v34  ;;  %v1058_v10 = vsel %vm838_vm2, %v2400_v33, 0.0 }
 0x3e8   : > { %1059 = vadd.xlane.f32.xlu1 %v1058_v10 }
 0x3ed   : > { %v2408_v40 = vpop.eup %1822 }
 0x3ee   : > { %v2410_v41 = vpop.eup %1824  ;;  %v1064_v42 = vsel %vm838_vm2, %v2408_v40, 0.0 }
 0x3f9   : > { %690 = vrot.lane.b32.xlu1 %v2324_v12, %s2042_s16  ;;  %v1061_v12 = vsel %vm838_vm2, %v2410_v41, 0.0 }
 0x3fd   : > { %692 = vrot.lane.b32.xlu0 %v2322_v11, %s2042_s16  ;;  %v687_v11 = vpop.permute.xlu0 %686  ;;  %s2046_s16 = smov [#allocation10]  }
 0x41c   : > { %1065 = vadd.xlane.f32.xlu0 %v1064_v42 }
 0x41d   : > { %1062 = vadd.xlane.f32.xlu1 %v1061_v12 }
 0x474   : > { %v1057_v44 = vpop.xlane.xlu0 %1056 }
 0x475   : > { %v1060_v45 = vpop.xlane.xlu1 %1059  ;;  %1826 = vrcp.f32 %v1057_v44 }
 0x476   : > { %1828 = vrcp.f32 %v1060_v45 }
 0x478   : > { %v693_v46 = vpop.permute.xlu0 %692 }
 0x479   : > { %v714_v47 = vcombine.low %v689_v43, %v693_v46  ;;  %v715_v48 = vcombine.high %v689_v43, %v693_v46  ;;  %v691_v49 = vpop.permute.xlu1 %690 }
 0x47a   : > { %v698_v50 = vcombine.low %v687_v11, %v691_v49  ;;  %v699_v51 = vcombine.high %v687_v11, %v691_v49 }
 0x47b   : > { %v722_v52 = vrot.slane %v714_v47, %v2332_v22  ;;  %v729_v53 = vrot.slane %v715_v48, %v2332_v22 }
 0x47c   : > { %v706_v54 = vrot.slane %v698_v50, %v2332_v22  ;;  %v713_v55 = vrot.slane %v699_v51, %v2332_v22 }
 0x47e   : > { %v730_v56 = vcombine.low %v706_v54, %v722_v52  ;;  %v731_v57 = vcombine.high %v706_v54, %v722_v52  ;;  %v746_v58 = vcombine.low %v713_v55, %v729_v53  ;;  %v747_v59 = vcombine.high %v713_v55, %v729_v53 }
 0x47f   : > { %v1827_v19 = vpop.eup %1826 }
 0x480   : > { %v738_v60 = vrot.slane %v730_v56, %v2342_v32  ;;  %v745_v61 = vrot.slane %v731_v57, %v2342_v32  ;;  %v754_v62 = vrot.slane %v746_v58, %v2342_v32  ;;  %v761_v63 = vrot.slane %v747_v59, %v2342_v32  ;;  %v1829_v23 = vpop.eup %1828 }
 0x481   : > { %v1071_v28 = vmul.f32 %v1827_v19, %v2398_v31  ;;  %v1072_v29 = vmul.f32 %v1829_v23, %v2400_v33 }
 0x482   : > { %v766_v1 = vcombine.low %v738_v60, %v745_v61  ;;  %v1617_v2 = vcombine.high %v738_v60, %v745_v61  ;;  %v782_v3 = vcombine.low %v754_v62, %v761_v63  ;;  %v1618_v4 = vcombine.high %v754_v62, %v761_v63 }
 0x483   : > { %v1075_v37 = vpack.c.bf16 %v1071_v28, %v1071_v28  ;;  %v1076_v38 = vpack.c.bf16 %v1072_v29, %v1072_v29 }
 0x484   : > { %v773_v5 = vrot.slane %v766_v1, %v2332_v22  ;;  %v781_v7 = vrot.slane %v1617_v2, %v2332_v22  ;;  %v789_v8 = vrot.slane %v782_v3, %v2332_v22  ;;  %v797_v9 = vrot.slane %v1618_v4, %v2332_v22 }
 0x486   : > { %v798_v13 = vcombine.low %v773_v5, %v781_v7  ;;  %v799_v14 = vcombine.high %v773_v5, %v781_v7  ;;  %v814_v15 = vcombine.low %v789_v8, %v797_v9  ;;  %v815_v16 = vcombine.high %v789_v8, %v797_v9 }
 0x488   : > { %v806_v17 = vrot.slane %v798_v13, %v2342_v32  ;;  %v813_v18 = vrot.slane %v799_v14, %v2342_v32  ;;  %v822_v20 = vrot.slane %v814_v15, %v2342_v32  ;;  %v829_v21 = vrot.slane %v815_v16, %v2342_v32  ;;  %v1816_v14 = vld [vmem:[#allocation8] sm:$0xff]  }
 0x48a   : > { %v830_v24 = vcombine.low %v806_v17, %v822_v20  ;;  %v831_v25 = vcombine.high %v806_v17, %v822_v20  ;;  %v832_v26 = vcombine.low %v813_v18, %v829_v21  ;;  %v833_v27 = vcombine.high %v813_v18, %v829_v21 }
 0x48c   : > { %v834_v30 = vpack.c.bf16 %v830_v24, %v830_v24  ;;  %v835_v34 = vpack.c.bf16 %v831_v25, %v831_v25  ;;  %v836_v35 = vpack.c.bf16 %v832_v26, %v832_v26  ;;  %v837_v36 = vpack.c.bf16 %v833_v27, %v833_v27  ;;  %v1817_v24 = vld [vmem:[#allocation8 + $0x8] sm:$0xff]  }
 0x48e   : > { %v1084_v10 = vsel %vm1082_vm3, %v834_v30, 0  ;;  %v1130_v6 = vsel %vm1082_vm3, %v835_v34, 0  ;;  %v1176_v31 = vsel %vm1082_vm3, %v836_v35, 0  ;;  %v1222_v33 = vsel %vm1082_vm3, %v837_v36, 0 }
 0x48f   : > { %1692 = vmatpush3.bf16.msra.mxu1 %v1084_v10  ;;  %1698 = vmatpush3.bf16.msra.mxu0 %v1130_v6 }
 0x490   : > { %1703 = vmatprep.subr.bf16.mxu1 %v2034_v0  ;;  %1709 = vmatprep.subr.bf16.mxu0 %v2034_v0 }
 0x492   : > { %1694 = vmatmul.mubr.msk.bf16.vlgmr.msra.gmra.mrb[8].mxu1 %vm838_vm2, %v1075_v37  ;;  %1700 = vmatmul.mubr.msk.bf16.vlgmr.msra.gmra.mrb[12].mxu0 %vm838_vm2, %v1076_v38 }
 0x493   : > { %1704 = vmatpush3.bf16.msra.mxu1 %v1176_v31  ;;  %1710 = vmatpush3.bf16.msra.mxu0 %v1222_v33 }
 0x494   : > { %1705 = vmatprep.mubr.msk.bf16.mxu1 %vm2035_vm0, %v2034_v0  ;;  %1711 = vmatprep.mubr.msk.bf16.mxu0 %vm2035_vm0, %v2034_v0 }
 0x495   : > { %1715 = vmatprep.subr.bf16.mxu1 %v2034_v0 }
 0x4a9   : > { %v1066_v39 = vpop.xlane.xlu0 %1065 }
 0x4aa   : > { %1830 = vrcp.f32 %v1066_v39  ;;  %v1063_v42 = vpop.xlane.xlu1 %1062 }
 0x4ab   : > { %1832 = vrcp.f32 %v1063_v42 }
 0x4b4   : > { %v1831_v12 = vpop.eup %1830 }
 0x4b5   : > { %v1833_v11 = vpop.eup %1832  ;;  %v1074_v43 = vmul.f32 %v1831_v12, %v2408_v40 }
 0x4b6   : > { %v1073_v44 = vmul.f32 %v1833_v11, %v2410_v41 }
 0x4b7   : > { %v1078_v45 = vpack.c.bf16 %v1074_v43, %v1074_v43 }
 0x4b8   : > { %v1077_v46 = vpack.c.bf16 %v1073_v44, %v1073_v44  ;;  %v1629_v44 = vld [vmem:[%s2530_s5] ss:$0 sm:$0xff] }
 0x4b9   : > { %1712 = vmatmul.mubr.msk.bf16.vlgmr.msra.gmra.mrb[16].mxu0 %vm838_vm2, %v1078_v45 }
 0x4ba   : > { %1706 = vmatmul.mubr.msk.bf16.vlgmr.msra.gmra.mrb[12].mxu1 %vm838_vm2, %v1077_v46 }
 0x4bb   : > { %1719 = vmatprep.mubr.msk.bf16.mxu1 %vm2035_vm0, %v2034_v0  ;;  %1716 = vmatpush3.bf16.msra.mxu1 %v1816_v14 }
 0x4bc   : > { %1717 = vmatprep.subr.bf16.mxu1 %v2034_v0 }
 0x4bf   : > { %1718 = vmatpush3.bf16.msra.mxu1 %v1817_v24 }
 0x565   : > { %v1120_v47 = vpop.f32.mrb[8].mxu1  ;;  %v1166_v48 = vpop.f32.mrb[12].mxu0 }
 0x566   : > { %v1695_v49 = vpop.f32.mrb[9].mxu1  ;;  %v1701_v50 = vpop.f32.mrb[13].mxu0 }
 0x567   : > { %v1123_v51 = vpop.f32.mrb[10].mxu1  ;;  %v1169_v52 = vpop.f32.mrb[14].mxu0 }
 0x568   : > { %v1696_v53 = vpop.f32.mrb[11].mxu1  ;;  %v1702_v54 = vpop.f32.mrb[15].mxu0 }
 0x58c   : > { %v1258_v40 = vpop.f32.mrb[16].mxu0 }
 0x58d   : > { %v1212_v55 = vpop.f32.mrb[12].mxu1  ;;  %v1280_v41 = vcombine.low %v1166_v48, %v1258_v40  ;;  %v1281_v56 = vcombine.high %v1166_v48, %v1258_v40  ;;  %v1713_v57 = vpop.f32.mrb[17].mxu0 }
 0x58e   : > { %v1264_v58 = vcombine.low %v1120_v47, %v1212_v55  ;;  %v1265_v59 = vcombine.high %v1120_v47, %v1212_v55  ;;  %v1707_v60 = vpop.f32.mrb[13].mxu1  ;;  %v1261_v61 = vpop.f32.mrb[18].mxu0 }
 0x58f   : > { %v1288_v62 = vrot.slane %v1280_v41, %v2332_v22  ;;  %v1295_v63 = vrot.slane %v1281_v56, %v2332_v22  ;;  %v1215_v1 = vpop.f32.mrb[14].mxu1  ;;  %v1714_v2 = vpop.f32.mrb[19].mxu0 }
 0x590   : > { %v1272_v3 = vrot.slane %v1264_v58, %v2332_v22  ;;  %v1279_v4 = vrot.slane %v1265_v59, %v2332_v22  ;;  %v1708_v5 = vpop.f32.mrb[15].mxu1 }
 0x592   : > { %v1296_v7 = vcombine.low %v1272_v3, %v1288_v62  ;;  %v1297_v8 = vcombine.high %v1272_v3, %v1288_v62  ;;  %v1312_v9 = vcombine.low %v1279_v4, %v1295_v63  ;;  %v1313_v13 = vcombine.high %v1279_v4, %v1295_v63 }
 0x594   : > { %v1304_v15 = vrot.slane %v1296_v7, %v2342_v32  ;;  %v1311_v16 = vrot.slane %v1297_v8, %v2342_v32  ;;  %v1320_v17 = vrot.slane %v1312_v9, %v2342_v32  ;;  %v1327_v18 = vrot.slane %v1313_v13, %v2342_v32 }
 0x596   : > { %v1332_v19 = vcombine.low %v1304_v15, %v1311_v16  ;;  %v1627_v20 = vcombine.high %v1304_v15, %v1311_v16  ;;  %v1348_v21 = vcombine.low %v1320_v17, %v1327_v18  ;;  %v1628_v23 = vcombine.high %v1320_v17, %v1327_v18 }
 0x598   : > { %v1339_v25 = vrot.slane %v1332_v19, %v2332_v22  ;;  %v1347_v26 = vrot.slane %v1627_v20, %v2332_v22  ;;  %v1355_v27 = vrot.slane %v1348_v21, %v2332_v22  ;;  %v1363_v28 = vrot.slane %v1628_v23, %v2332_v22 }
 0x59a   : > { %v1365_v29 = vcombine.high %v1339_v25, %v1347_v26  ;;  %v1381_v30 = vcombine.high %v1355_v27, %v1363_v28  ;;  %v1364_v34 = vcombine.low %v1339_v25, %v1347_v26  ;;  %v1380_v10 = vcombine.low %v1355_v27, %v1363_v28 }
 0x59c   : > { %v1379_v0 = vrot.slane %v1365_v29, %v2342_v32  ;;  %v1395_v6 = vrot.slane %v1381_v30, %v2342_v32  ;;  %v1372_v35 = vrot.slane %v1364_v34, %v2342_v32  ;;  %v1388_v36 = vrot.slane %v1380_v10, %v2342_v32 }
 0x59e   : > { %v1398_v37 = vcombine.low %v1379_v0, %v1395_v6  ;;  %v1397_v38 = vcombine.high %v1372_v35, %v1388_v36  ;;  %v1399_v31 = vcombine.high %v1379_v0, %v1395_v6  ;;  %v1396_v33 = vcombine.low %v1372_v35, %v1388_v36 }
 0x5a0   : > { %1405 = vrot.lane.b32.xlu1 %v1398_v37, %s2043_s19  ;;  %1401 = vrot.lane.b32.xlu0 %v1397_v38, %s2044_s26  ;;  %s1952_s19 = sshll.u32 %s2046_s16, 4  ;;  %s1953_s19 = int_to_ptr.vmem [resolvable:$false] %s1952_s19 }
 0x5a1   : > { %s1954_s26 = scalar_lea.vmem %s1953_s19, 256  ;;  %p1955_p2 = scmp.lt.s32.totalorder %s2482_s29, %s1953_s19 }
 0x5a2   : > { %p1956_p4 = scmp.lt.s32.totalorder %s1954_s26, %s1948_s9 }
 0x5a4   : > { %1409 = vrot.lane.b32.xlu1 %v1399_v31, %s2045_s13  ;;  %p1957_p0 = por %p1956_p4, %p1955_p2 }
 0x5a6   : > { %p1958_p9 = pnand %p1957_p0, %p1951_p1 }
 0x612   : > { %v1406_v22 = vpop.permute.xlu1 %1405  ;;  %v1402_v39 = vpop.permute.xlu0 %1401 }
 0x613   : > { %v1412_v42 = vsel %vm838_vm2, %v1396_v33, %v1402_v39 }
 0x614   : > { %v1414_v32 = vsel %vm1413_vm4, %v1412_v42, %v1406_v22 }
 0x616   : > { %v1410_v12 = vpop.permute.xlu1 %1409 }
 0x617   : > { %v1416_v11 = vsel %vm1415_vm5, %v1414_v32, %v1410_v12 }
 0x618   : > { %v1417_v43 = vpack.c.bf16 %v1416_v11, %v1416_v11 }
 0x61a   : > { %1720 = vmatmul.mubr.msk.bf16.vlgmr.msra.gmra.mrb[16].mxu1 %vm334_vm1, %v1417_v43 }
 0x6ed   : > { %v1473_v45 = vpop.f32.mrb[16].mxu1 }
 0x6ee   : > { %v1474_v46 = vadd.f32 %v1629_v44, %v1473_v45  ;;  %v1721_v47 = vpop.f32.mrb[17].mxu1 }
 0x6ef   : > { %v1476_v48 = vpop.f32.mrb[18].mxu1 }
 0x6f0   : > { %v1722_v49 = vpop.f32.mrb[19].mxu1  ;;  %1479 = vst.msk [vmem:[%s308_s27] sm:$0xff] %vm334_vm1, %v1474_v46 }
 0x6f1   : > { %1961 = shalt.err (!%p1958_p9)
}
 0x6f2   : > { %s1962_s17 = scalar_lea.hbm %s2480_s11, 128  ;;  %s1966_s10 = scalar_lea.hbm %s2531_s6, 256 }
 0x6f3   : > { %p1963_p8 = scmp.ne.s32.totalorder %s2480_s11, %s1962_s17  ;;  %p1967_p6 = scmp.lt.u32.totalorder %s2480_s11, %s2531_s6 }
 0x6f4   : > { %p1968_p10 = scmp.lt.u32.totalorder %s1966_s10, %s1962_s17  ;;  %p1970_p7 = scmp.lt.u32.totalorder %s1962_s17, %s2480_s11 }
 0x6f5   : > { %p1964_p11 = pnand %p1963_p8, %p2233_p5 }
 0x6f6   : > { %p1969_p3 = por %p1968_p10, %p1967_p6 }
 0x6f7   : > { %p1965_p13 = pneg %p1964_p11 }
 0x6f8   : > { %p1971_p12 = por %p1970_p7, %p1969_p3 }
 0x6fa   : > { %p1972_p1 = pnand %p1971_p12, %p1965_p13 }
 0x6fc   : > { %1975 = shalt.err (!%p1972_p1)
}
 0x6fd   : > { %1737 = dma.vmem_to_hbm [thread:$0]  (%p2233_p5), %s2482_s29, 128, %s2480_s11, %s1481_s25  }
 0x6fe PF: > { %s1506_s27 = sand.u32 1, %s2014_s21   ;;  %p2551_p2 = scmp.ne.s32.totalorder %s2536_s28, 0 }
 0x6ff   : > { %p2552_p4 = scmp.ge.s32.totalorder %s2026_s24, 2  ;;  %s1507_s20 = scalar_lea.sflag [#allocation4], %s1506_s27 }
 0x701   : > { %p1754_p0 = pnand %p2552_p4, %p2551_p2 }
 0x703   : > { %2009 = dma.done.wait (!%p1754_p0), %s1507_s20, 128  }
 0x704   : > { %2011 = vsyncadd (!%p1754_p0), %s1507_s20, 4294967168  ;;  %p21_p9 = scmp.ge.s32.totalorder %s2219_s8, 4   ;;  %s2553_s21 = smov %s2018_s22 }
 0x705   : > { %s2554_s22 = smov %s2022_s23  ;;  %s2555_s23 = smov %s2229_s14 }
 0x706   : > { %s2556_s24 = smov %s2219_s8  ;;  %23 = sbr.rel (!%p21_p9) target bundleno = 7 (0x7), region = 102 }
 0x70d   :  { %1512 = vsyncpa [#allocation3], 1 }
 0x70e   :  { %1514 = vsyncpa [#allocation3 + $0x1], 1 }
 0x70f   :  { %1515 = vsyncpa [#allocation6], 1 }
 0x710   :  { %1517 = vsyncpa [#allocation6 + $0x1], 1 }
 0x711   :  { %1518 = vsyncpa [#allocation9], 1 }
 0x712   :  { %1519 = vsyncpa [#allocation4], 1 }
 0x713   :  { %1521 = vsyncpa [#allocation4 + $0x1], 1 }

// kernel: tpu_custom_call.1
= control target key start
LH: loop header
LB: loop body
LE: loop exit
PB: predicated region body
PF: predicated region fallthrough
CT: control target
= control target key end

     0   :  { %11 = vsyncpa [#allocation3], 0  ;;  %s2525_s0 = inlined_call_operand.hbm [shape: f32[8,8], index: 0, kind: input, shape index: {}]   ;;  %s2526_s1 = inlined_call_operand.hbm [shape: bf16[2,8,32], index: 1, kind: input, shape index: {}]   ;;  %s2527_s2 = inlined_call_operand.hbm [shape: bf16[32,96], index: 2, kind: input, shape index: {}]   ;;  %s2528_s3 = inlined_call_operand.vmem [shape: f32[1,96], index: 3, kind: input, shape index: {}]   ;;  %s2529_s4 = inlined_call_operand.hbm [shape: bf16[32,32], index: 4, kind: input, shape index: {}]   ;;  %s2530_s5 = inlined_call_operand.vmem [shape: f32[1,32], index: 5, kind: input, shape index: {}]   ;;  %s2531_s6 = inlined_call_operand.hbm [shape: f32[2,8,32], index: 6, kind: output, shape index: {}]  }
   0x1   :  { %12 = vsyncpa [#allocation6], 0 }
   0x2   :  { %14 = vsyncpa [#allocation6 + $0x1], 0 }
   0x3   :  { %15 = vsyncpa [#allocation9], 0 }
   0x4   :  { %16 = vsyncpa [#allocation4], 0 }
   0x5   :  { %18 = vsyncpa [#allocation4 + $0x1], 0  ;;  %s2082_s21 = smov 0   ;;  %s2084_s22 = smov 0  }
   0x6   :  { %s2086_s23 = smov 0   ;;  %s2088_s24 = smov 0  }
   0x7 LB: > { %s2103_s25 = sadd.s32 4294967295, %s2026_s24   ;;  %s1595_s26 = sadd.s32 4294967294, %s2026_s24   ;;  %s2026_s24 = sphi %s2088_s24, %s2556_s24   ;;  %s2022_s23 = sphi %s2086_s23, %s2555_s23   ;;  %s2018_s22 = sphi %s2084_s22, %s2554_s22   ;;  %s2014_s21 = sphi %s2082_s21, %s2553_s21  }
   0x8   : > { %p65_p0 = scmp.ne.s32.totalorder %s2018_s22, %s2014_s21  ;;  %p2532_p1 = scmp.eq.s32.totalorder %s2103_s25, 0 }
   0x9   : > { %p179_p3 = scmp.eq.s32.totalorder %s1595_s26, 1  ;;  %p1596_p5 = scmp.ge.s32.totalorder %s2026_s24, 1 }
   0xa   : > { %p2112_p4 = por %p2532_p1, %p65_p0  ;;  %p186_p7 = scmp.lt.s32.totalorder %s2026_s24, 3 }
   0xb   : > { %p2117_p6 = por %p179_p3, %p65_p0  ;;  %s2028_s30 = smov [#allocation7]  }
   0xc   : > { %s2535_s27 = scalar_select %p2112_p4, 1, 0 }
   0xd   : > { %s2536_s28 = scalar_select %p2117_p6, 1, 0 }
   0xe   : > { %p2122_p8 = pnand %p1596_p5, %p186_p7  ;;  %s209_s7 = sshll.u32 %s2028_s30, 4  ;;  %s2126_s7 = int_to_ptr.vmem [resolvable:$true] %s209_s7 }
   0xf   : > { %s2029_s9 = smov [#allocation2]   ;;  %s2030_s11 = smov [#allocation8]  }
  0x10   : > { %s2537_s29 = scalar_select %p2122_p8, 1, 0 }
  0x11   : > { %p1739_p9 = pneg %p2122_p8  ;;  %s199_s10 = sshll.u32 %s2029_s9, 4  ;;  %s2137_s10 = int_to_ptr.vmem [resolvable:$true] %s199_s10 }
  0x12   : > { %s2139_s12 = sshll.u32 %s2030_s11, 4  ;;  %s1834_s15 = scalar_lea.hbm %s2527_s2, 256  ;;  %s226_s12 = int_to_ptr.vmem [resolvable:$true] %s2139_s12 }
  0x13   : > { %p2133_p11 = pnand %p1739_p9, %p2532_p1  ;;  %p1835_p12 = scmp.ne.s32.totalorder %s2527_s2, %s1834_s15 }
  0x14   : > { %p1841_p5 = scmp.lt.u32.totalorder %s1834_s15, %s2527_s2 }
  0x15   : > { %p2149_p13 = pneg %p2133_p11 }
  0x17   : > { %p1837_p0 = pnand %p2149_p13, %p1835_p12 }
  0x19   : > { %p1838_p3 = pneg %p1837_p0 }
  0x1b   : > { %p1843_p7 = pnand %p1841_p5, %p1838_p3 }
  0x1d   : > { %1846 = shalt.err (!%p1843_p7)
}
  0x1e   : > { %s1847_s26 = scalar_lea.vmem %s2126_s7, 256  ;;  %p1855_p2 = scmp.lt.s32.totalorder %s2126_s7, %s2126_s7 }
  0x1f   : > { %p1848_p9 = scmp.ne.s32.totalorder %s2126_s7, %s1847_s26  ;;  %p1856_p6 = scmp.lt.s32.totalorder %s1847_s26, %s1847_s26 }
  0x21   : > { %p1850_p10 = pnand %p1848_p9, %p2149_p13  ;;  %p1857_p12 = por %p1856_p6, %p1855_p2 }
  0x23   : > { %p1851_p1 = pneg %p1850_p10 }
  0x25   : > { %p1858_p0 = pnand %p1857_p12, %p1851_p1 }
  0x27   : > { %1861 = shalt.err (!%p1858_p0)
}
  0x28   : > { %s2031_s30 = smov 64   ;;  %s2032_s9 = smov 4  }
  0x29   : > { %1745 = dma.hbm_to_vmem [thread:$0]  (!%p2133_p11), %s2527_s2, 256, %s2126_s7, [#allocation6], %s2031_s30, %s2031_s30, %s2032_s9  }
  0x2a   : > { %s1862_s16 = scalar_lea.hbm %s2525_s0, 128 }
  0x2b   : > { %p1863_p1 = scmp.ne.s32.totalorder %s2525_s0, %s1862_s16  ;;  %p1869_p10 = scmp.lt.u32.totalorder %s1862_s16, %s2525_s0 }
  0x2d   : > { %p1865_p2 = pnand %p1863_p1, %p2149_p13 }
  0x2f   : > { %p1866_p6 = pneg %p1865_p2 }
  0x31   : > { %p1871_p3 = pnand %p1869_p10, %p1866_p6 }
  0x33   : > { %1874 = shalt.err (!%p1871_p3)
}
  0x34   : > { %s1875_s7 = scalar_lea.vmem %s2137_s10, 128  ;;  %p1883_p12 = scmp.lt.s32.totalorder %s2137_s10, %s2137_s10 }
  0x35   : > { %p1876_p5 = scmp.ne.s32.totalorder %s2137_s10, %s1875_s7  ;;  %p1884_p0 = scmp.lt.s32.totalorder %s1875_s7, %s1875_s7 }
  0x37   : > { %p1878_p7 = pnand %p1876_p5, %p2149_p13  ;;  %p1885_p1 = por %p1884_p0, %p1883_p12 }
  0x39   : > { %p1879_p9 = pneg %p1878_p7 }
  0x3b   : > { %p1886_p2 = pnand %p1885_p1, %p1879_p9 }
  0x3d   : > { %1889 = shalt.err (!%p1886_p2)
}
  0x3e   : > { %1742 = dma.hbm_to_vmem [thread:$0]  (!%p2133_p11), %s2525_s0, 128, %s2137_s10, [#allocation3]  }
  0x3f   : > { %s1890_s16 = scalar_lea.hbm %s2529_s4, 256 }
  0x40   : > { %p1891_p6 = scmp.ne.s32.totalorder %s2529_s4, %s1890_s16  ;;  %p1897_p5 = scmp.lt.u32.totalorder %s1890_s16, %s2529_s4 }
  0x42   : > { %p1893_p10 = pnand %p1891_p6, %p2149_p13 }
  0x44   : > { %p1894_p3 = pneg %p1893_p10 }
  0x46   : > { %p1899_p7 = pnand %p1897_p5, %p1894_p3 }
  0x48   : > { %1902 = shalt.err (!%p1899_p7)
}
  0x49   : > { %s1903_s7 = scalar_lea.vmem %s226_s12, 256  ;;  %p1911_p1 = scmp.lt.s32.totalorder %s226_s12, %s226_s12 }
  0x4a   : > { %p1904_p9 = scmp.ne.s32.totalorder %s226_s12, %s1903_s7  ;;  %p1912_p2 = scmp.lt.s32.totalorder %s1903_s7, %s1903_s7 }
  0x4c   : > { %p1906_p12 = pnand %p1904_p9, %p2149_p13  ;;  %p1913_p4 = por %p1912_p2, %p1911_p1 }
  0x4e   : > { %p1907_p0 = pneg %p1906_p12 }
  0x50   : > { %p1914_p8 = pnand %p1913_p4, %p1907_p0 }
  0x52   : > { %1917 = shalt.err (!%p1914_p8)
}
  0x53   : > { %1748 = dma.hbm_to_vmem [thread:$0]  (!%p2133_p11), %s2529_s4, 256, %s226_s12, [#allocation9], %s2031_s30, %s2031_s30, %s2032_s9  }
  0x54   : > { %s2219_s8 = sadd.s32 1, %s2026_s24   ;;  %s52_s13 = sadd.s32 1, %s2022_s23 }
  0x55   : > { %s49_s18 = ssub.s32 %s2026_s24, %s2219_s8  ;;  %p59_p8 = scmp.ne.s32.totalorder %s2022_s23, %s2018_s22 }
  0x56   : > { %p50_p4 = scmp.eq.s32.totalorder %s49_s18, 0  ;;  %p60_p13 = scmp.eq.s32.totalorder %s2026_s24, 0 }
  0x57   : > { %p1760_p6 = scmp.lt.s32.totalorder %s2026_s24, 2  ;;  %p2540_p3 = scmp.eq.s32.totalorder %s2103_s25, 1 }
  0x58   : > { %s2229_s14 = scalar_select %p50_p4, %s2022_s23, %s52_s13  }
  0x59   : > { %p61_p10 = por %p60_p13, %p59_p8  ;;  %p2233_p5 = por %p2540_p3, %p59_p8 }
  0x5a   : > { %s242_s16 = sand.u32 1, %s2026_s24   ;;  %s244_s17 = sand.u32 1, %s2022_s23  }
  0x5b   : > { %s1601_s12 = sshll.u32 %s244_s17, 2  ;;  %s1602_s30 = sshll.u32 %s2026_s24, 6 }
  0x5c   : > { %s2243_s20 = scalar_lea.hbm %s2526_s1, %s1602_s30  ;;  %s246_s26 = scalar_lea.vmem [#allocation5], %s1601_s12 }
  0x5d   : > { %s253_s7 = sshll.u32 %s246_s26, 4  ;;  %p2247_p11 = pnand %p1760_p6, %p61_p10  ;;  %s2245_s7 = int_to_ptr.vmem [resolvable:$true] %s253_s7 }
  0x5e   : > { %s243_s11 = scalar_lea.sflag [#allocation6], %s242_s16  ;;  %s1918_s18 = scalar_lea.hbm %s2243_s20, 64 }
  0x5f   : > { %p1919_p7 = scmp.ne.s32.totalorder %s2243_s20, %s1918_s18  ;;  %p1920_p9 = pneg %p2247_p11 }
  0x60   : > { %s1923_s12 = scalar_lea.hbm %s2526_s1, 128  ;;  %p1924_p1 = scmp.lt.u32.totalorder %s2243_s20, %s2526_s1 }
  0x61   : > { %p1921_p12 = pnand %p1920_p9, %p1919_p7  ;;  %p1925_p2 = scmp.lt.u32.totalorder %s1923_s12, %s1918_s18 }
  0x62   : > { %p1927_p8 = scmp.lt.u32.totalorder %s1918_s18, %s2243_s20 }
  0x63   : > { %p1922_p0 = pneg %p1921_p12  ;;  %p1926_p4 = por %p1925_p2, %p1924_p1 }
  0x65   : > { %p1928_p13 = por %p1927_p8, %p1926_p4 }
  0x67   : > { %p1929_p6 = pnand %p1928_p13, %p1922_p0 }
  0x69   : > { %1932 = shalt.err (!%p1929_p6)
}
  0x6a   : > { %s1933_s16 = scalar_lea.vmem %s2245_s7, 64  ;;  %s2033_s19 = smov [#allocation5]  }
  0x6b   : > { %p1934_p10 = scmp.ne.s32.totalorder %s2245_s7, %s1933_s16  ;;  %s1938_s26 = sshll.u32 %s2033_s19, 4  ;;  %s1939_s26 = int_to_ptr.vmem [resolvable:$false] %s1938_s26 }
  0x6c   : > { %s1940_s13 = scalar_lea.vmem %s1939_s26, 128  ;;  %p1941_p12 = scmp.lt.s32.totalorder %s2245_s7, %s1939_s26 }
  0x6d   : > { %p1936_p3 = pnand %p1934_p10, %p1920_p9  ;;  %p1942_p1 = scmp.lt.s32.totalorder %s1940_s13, %s1933_s16 }
  0x6f   : > { %p1937_p7 = pneg %p1936_p3  ;;  %p1943_p2 = por %p1942_p1, %p1941_p12 }
  0x71   : > { %p1944_p4 = pnand %p1943_p2, %p1937_p7 }
  0x73   : > { %1947 = shalt.err (!%p1944_p4)
}
  0x74   : > { %1752 = dma.hbm_to_vmem [thread:$0]  (!%p2247_p11), %s2243_s20, 64, %s2245_s7, %s243_s11  }
  0x75   : > { %p2543_p0 = scmp.ne.s32.totalorder %s2537_s29, 0 }
  0x76   : > { %p2544_p9 = scmp.eq.s32.totalorder (!%p2543_p0), %s2103_s25, 0 }
  0x77   : > { %262 = sbr.rel (%p2543_p0) target bundleno = 1790 (0x6fe), region = 44 }
  0x7e   : > { %1993 = dma.done.wait (%p2544_p9), [#allocation3], 128   ;;  %p2545_p8 = pmov %p2544_p9 }
  0x7f   : > { %s268_s18 = sand.u32 1, %s2103_s25   ;;  %s2284_s17 = sand.u32 1, %s2018_s22  }
  0x80   : > { %1995 = vsyncadd (%p2545_p8), [#allocation3], 4294967168  ;;  %s1605_s10 = sshll.u32 %s2284_s17, 2  ;;  %s269_s12 = scalar_lea.sflag [#allocation6], %s268_s18 }
  0x81   : > { %s272_s30 = scalar_lea.vmem [#allocation5], %s1605_s10  ;;  %p2546_p11 = scmp.ne.s32.totalorder %s2535_s27, 0 }
  0x83   : > { %1997 = dma.done.wait (%p2546_p11), %s269_s12, 64  }
  0x84   : > { %1999 = vsyncadd (%p2546_p11), %s269_s12, 4294967232  ;;  %p2547_p13 = pmov %p2545_p8 }
  0x85   : > { %p2548_p6 = pmov %p2545_p8 }
  0x86   : > { %2001 = dma.done.wait (%p2547_p13), [#allocation6], 256  }
  0x87   : > { %2003 = vsyncadd (%p2548_p6), [#allocation6], 4294967040  ;;  %p2549_p10 = pmov %p2548_p6 }
  0x88   : > { %p2550_p3 = pmov %p2548_p6 }
  0x89   : > { %2005 = dma.done.wait (%p2549_p10), [#allocation9], 256  }
  0x8a   : > { %2007 = vsyncadd (%p2550_p3), [#allocation9], 4294967040  ;;  %v2034_v0 = vmov 0.0   ;;  %vm2035_vm0 = vmmov 0   ;;  %v1814_v1 = vld [vmem:[#allocation7] sm:$0xff]   ;;  %v1815_v2 = vld [vmem:[#allocation7 + $0x8] sm:$0xff]   ;;  %v399_v15 = vlaneseq }
  0x8b   : > { %1659 = vmatprep.subr.bf16.mxu0 %v2034_v0  ;;  %1663 = vmatprep.mubr.msk.bf16.mxu0 %vm2035_vm0, %v2034_v0  ;;  %v310_v3 = vld [vmem:[%s272_s30] sm:$0xf]  ;;  %vm334_vm1 = vcmask 261120   ;;  %v1609_v4 = vld [vmem:[%s2528_s3] ss:$0 sm:$0xff]  ;;  %s2036_s20 = smov 104  }
  0x8c   : > { %1667 = vmatprep.subr.bf16.mxu1 %v2034_v0  ;;  %1669 = vmatprep.mubr.msk.bf16.mxu1 %vm2035_vm0, %v2034_v0  ;;  %s2037_s7 = smov 120   ;;  %s2038_s11 = smov 96   ;;  %v2040_v13 = vmov 1983009808   ;;  %v400_v17 = vshrl.u32 %v399_v15, 7  ;;  %vm838_vm2 = vcmask 64512  }
  0x8d   : > { %1660 = vmatpush3.bf16.msra.mxu0 %v1814_v1  ;;  %s2039_s9 = smov 112   ;;  %v397_v14 = vunpack.c.l.s4 %v2040_v13  ;;  %v2041_v18 = vmov 1934713408   ;;  %s2042_s16 = smov 64   ;;  %vm1082_vm3 = vcmask 1043456   ;;  %vm1413_vm4 = vcmask 130048  }
  0x8e   : > { %1661 = vmatprep.subr.bf16.mxu0 %v2034_v0  ;;  %v429_v19 = vunpack.c.l.s4 %v2041_v18  ;;  %s2043_s19 = smov 16   ;;  %s2044_s26 = smov 8   ;;  %vm1415_vm5 = vcmask 195584  }
  0x8f   : > { %v398_v16 = vunpack.c.0.s8 %v397_v14  ;;  %s2045_s13 = smov 24   ;;  %s1608_s18 = sshll.u32 %s2284_s17, 3 }
  0x90   : > { %v430_v25 = vunpack.c.0.s8 %v429_v19  ;;  %s1634_s30 = sshll.u32 %s2103_s25, 7  ;;  %s308_s27 = scalar_lea.vmem [#allocation10], %s1608_s18 }
  0x91   : > { %1662 = vmatpush3.bf16.msra.mxu0 %v1815_v2  ;;  %v2332_v22 = vsub.s32 %v398_v16, %v400_v17  ;;  %s1494_s29 = sshll.u32 %s308_s27, 4  ;;  %s1481_s25 = scalar_lea.sflag [#allocation4], %s2284_s17  ;;  %s2482_s29 = int_to_ptr.vmem [resolvable:$true] %s1494_s29 }
  0x92   : > { %1673 = vmatprep.subr.bf16.mxu0 %v2034_v0  ;;  %v2342_v32 = vsub.s32 %v430_v25, %v400_v17 }
  0x94   : > { %1664 = vmatmul.mubr.msk.bf16.vlgmr.msra.gmra.mrb[0].mxu0 %vm334_vm1, %v310_v3 }
  0x95   : > { %1675 = vmatprep.mubr.msk.bf16.mxu0 %vm2035_vm0, %v2034_v0 }
 0x167   : > { %v372_v5 = vpop.f32.mrb[0].mxu0 }
 0x168   : > { %v2313_v6 = vadd.f32 %v1609_v4, %v372_v5  ;;  %v1665_v7 = vpop.f32.mrb[1].mxu0 }
 0x169   : > { %v375_v8 = vpop.f32.mrb[2].mxu0 }
 0x16a   : > { %391 = vrot.lane.b32.xlu1 %v2313_v6, %s2036_s20  ;;  %385 = vrot.lane.b32.xlu0 %v2313_v6, %s2037_s7  ;;  %v1666_v9 = vpop.f32.mrb[3].mxu0 }
 0x16e   : > { %534 = vrot.lane.b32.xlu1 %v2313_v6, %s2038_s11  ;;  %388 = vrot.lane.b32.xlu0 %v2313_v6, %s2039_s9  ;;  %s1948_s9 = scalar_lea.vmem %s2482_s29, 128 }
 0x16f   : > { %p1949_p7 = scmp.ne.s32.totalorder %s2482_s29, %s1948_s9 }
 0x171   : > { %p1950_p12 = pnand %p1949_p7, %p2233_p5 }
 0x173   : > { %p1951_p1 = pneg %p1950_p12 }
 0x1dc   : > { %v2319_v10 = vpop.permute.xlu0 %385  ;;  %v2322_v11 = vpop.permute.xlu1 %391 }
 0x1dd   : > { %536 = vrot.lane.b32.xlu0 %v2319_v10, %s2038_s11  ;;  %v410_v23 = vcombine.low %v2319_v10, %v2322_v11  ;;  %v411_v24 = vcombine.high %v2319_v10, %v2322_v11 }
 0x1df   : > { %v418_v28 = vrot.slane %v410_v23, %v2332_v22  ;;  %v425_v29 = vrot.slane %v411_v24, %v2332_v22 }
 0x1e0   : > { %v2324_v12 = vpop.permute.xlu0 %388  ;;  %v535_v30 = vpop.permute.xlu1 %534 }
 0x1e1   : > { %540 = vrot.lane.b32.xlu0 %v2322_v11, %s2038_s11  ;;  %538 = vrot.lane.b32.xlu1 %v2324_v12, %s2038_s11  ;;  %v394_v20 = vcombine.low %v2313_v6, %v2324_v12  ;;  %v395_v21 = vcombine.high %v2313_v6, %v2324_v12  ;;  %s2480_s11 = scalar_lea.hbm %s2531_s6, %s1634_s30 }
 0x1e3   : > { %v402_v26 = vrot.slane %v394_v20, %v2332_v22  ;;  %v409_v27 = vrot.slane %v395_v21, %v2332_v22 }
 0x1e5   : > { %v426_v33 = vcombine.low %v402_v26, %v418_v28  ;;  %v427_v34 = vcombine.high %v402_v26, %v418_v28  ;;  %v442_v35 = vcombine.low %v409_v27, %v425_v29  ;;  %v443_v36 = vcombine.high %v409_v27, %v425_v29 }
 0x1e7   : > { %v434_v43 = vrot.slane %v426_v33, %v2342_v32  ;;  %v441_v44 = vrot.slane %v427_v34, %v2342_v32  ;;  %v450_v45 = vrot.slane %v442_v35, %v2342_v32  ;;  %v457_v46 = vrot.slane %v443_v36, %v2342_v32 }
 0x1e9   : > { %v462_v55 = vcombine.low %v434_v43, %v441_v44  ;;  %v1613_v56 = vcombine.high %v434_v43, %v441_v44  ;;  %v478_v57 = vcombine.low %v450_v45, %v457_v46  ;;  %v1614_v58 = vcombine.high %v450_v45, %v457_v46 }
 0x1eb   : > { %v469_v4 = vrot.slane %v462_v55, %v2332_v22  ;;  %v477_v5 = vrot.slane %v1613_v56, %v2332_v22  ;;  %v485_v7 = vrot.slane %v478_v57, %v2332_v22  ;;  %v493_v8 = vrot.slane %v1614_v58, %v2332_v22  ;;  %v378_v56 = vld [vmem:[#allocation2] sm:$0xff] }
 0x1ed   : > { %v494_v23 = vcombine.low %v469_v4, %v477_v5  ;;  %v510_v24 = vcombine.low %v485_v7, %v493_v8 }
 0x1ef   : > { %v518_v33 = vrot.slane %v510_v24, %v2342_v32 }
 0x24f   : > { %v537_v31 = vpop.permute.xlu0 %536 }
 0x253   : > { %v539_v37 = vpop.permute.xlu1 %538  ;;  %v541_v38 = vpop.permute.xlu0 %540 }
 0x254   : > { %v546_v39 = vcombine.low %v535_v30, %v539_v37  ;;  %v547_v40 = vcombine.high %v535_v30, %v539_v37  ;;  %v562_v41 = vcombine.low %v537_v31, %v541_v38  ;;  %v563_v42 = vcombine.high %v537_v31, %v541_v38 }
 0x255   : > { %v502_v31 = vrot.slane %v494_v23, %v2342_v32  ;;  %v495_v38 = vcombine.high %v469_v4, %v477_v5 }
 0x256   : > { %v554_v47 = vrot.slane %v546_v39, %v2332_v22  ;;  %v561_v48 = vrot.slane %v547_v40, %v2332_v22  ;;  %v570_v49 = vrot.slane %v562_v41, %v2332_v22  ;;  %v577_v50 = vrot.slane %v563_v42, %v2332_v22 }
 0x257   : > { %v511_v39 = vcombine.high %v485_v7, %v493_v8  ;;  %v526_v40 = vcombine.low %v502_v31, %v518_v33  ;;  %v527_v41 = vcombine.high %v502_v31, %v518_v33  ;;  %v509_v46 = vrot.slane %v495_v38, %v2342_v32 }
 0x258   : > { %v578_v51 = vcombine.low %v554_v47, %v570_v49  ;;  %v579_v52 = vcombine.high %v554_v47, %v570_v49  ;;  %v594_v53 = vcombine.low %v561_v48, %v577_v50  ;;  %v595_v54 = vcombine.high %v561_v48, %v577_v50 }
 0x259   : > { %v530_v44 = vpack.c.bf16 %v526_v40, %v526_v40  ;;  %v531_v45 = vpack.c.bf16 %v527_v41, %v527_v41  ;;  %v525_v47 = vrot.slane %v511_v39, %v2342_v32 }
 0x25a   : > { %v586_v59 = vrot.slane %v578_v51, %v2342_v32  ;;  %v593_v60 = vrot.slane %v579_v52, %v2342_v32  ;;  %v602_v61 = vrot.slane %v594_v53, %v2342_v32  ;;  %v609_v62 = vrot.slane %v595_v54, %v2342_v32 }
 0x25b   : > { %v528_v50 = vcombine.low %v509_v46, %v525_v47  ;;  %v529_v51 = vcombine.high %v509_v46, %v525_v47 }
 0x25c   : > { %v614_v63 = vcombine.low %v586_v59, %v593_v60  ;;  %v1615_v1 = vcombine.high %v586_v59, %v593_v60  ;;  %v630_v2 = vcombine.low %v602_v61, %v609_v62  ;;  %v1616_v3 = vcombine.high %v602_v61, %v609_v62 }
 0x25d   : > { %v532_v52 = vpack.c.bf16 %v528_v50, %v528_v50  ;;  %v533_v53 = vpack.c.bf16 %v529_v51, %v529_v51 }
 0x25e   : > { %v621_v9 = vrot.slane %v614_v63, %v2332_v22  ;;  %v629_v13 = vrot.slane %v1615_v1, %v2332_v22  ;;  %v637_v14 = vrot.slane %v630_v2, %v2332_v22  ;;  %v645_v15 = vrot.slane %v1616_v3, %v2332_v22 }
 0x260   : > { %v646_v16 = vcombine.low %v621_v9, %v629_v13  ;;  %v662_v17 = vcombine.low %v637_v14, %v645_v15  ;;  %v647_v18 = vcombine.high %v621_v9, %v629_v13  ;;  %v663_v19 = vcombine.high %v637_v14, %v645_v15 }
 0x262   : > { %v654_v20 = vrot.slane %v646_v16, %v2342_v32  ;;  %v670_v21 = vrot.slane %v662_v17, %v2342_v32  ;;  %v661_v27 = vrot.slane %v647_v18, %v2342_v32  ;;  %v677_v28 = vrot.slane %v663_v19, %v2342_v32 }
 0x264   : > { %v678_v25 = vcombine.low %v654_v20, %v670_v21  ;;  %v679_v26 = vcombine.high %v654_v20, %v670_v21  ;;  %v680_v36 = vcombine.low %v661_v27, %v677_v28  ;;  %v681_v37 = vcombine.high %v661_v27, %v677_v28 }
 0x266   : > { %v682_v29 = vpack.c.bf16 %v678_v25, %v678_v25  ;;  %v683_v30 = vpack.c.bf16 %v679_v26, %v679_v26  ;;  %v684_v42 = vpack.c.bf16 %v680_v36, %v680_v36  ;;  %v685_v43 = vpack.c.bf16 %v681_v37, %v681_v37 }
 0x268   : > { %v843_v34 = vsel %vm838_vm2, %v682_v29, 0  ;;  %v889_v35 = vsel %vm838_vm2, %v683_v30, 0  ;;  %v935_v48 = vsel %vm838_vm2, %v684_v42, 0  ;;  %v981_v49 = vsel %vm838_vm2, %v685_v43, 0 }
 0x269   : > { %1668 = vmatpush3.bf16.xpose.msra.mxu1 %v843_v34  ;;  %1674 = vmatpush3.bf16.xpose.msra.mxu0 %v889_v35 }
 0x26a   : > { %1679 = vmatprep.subr.bf16.mxu1 %v2034_v0  ;;  %1685 = vmatprep.subr.bf16.mxu0 %v2034_v0 }
 0x270   : > { %1670 = vmatmul.mubr.msk.bf16.vlgmr.msra.gmra.mrb[0].mxu1 %vm838_vm2, %v530_v44  ;;  %1676 = vmatmul.mubr.msk.bf16.vlgmr.msra.gmra.mrb[4].mxu0 %vm838_vm2, %v531_v45 }
 0x271   : > { %1680 = vmatpush3.bf16.xpose.msra.mxu1 %v935_v48  ;;  %1686 = vmatpush3.bf16.xpose.msra.mxu0 %v981_v49 }
 0x272   : > { %1681 = vmatprep.mubr.msk.bf16.mxu1 %vm2035_vm0, %v2034_v0  ;;  %1687 = vmatprep.mubr.msk.bf16.mxu0 %vm2035_vm0, %v2034_v0 }
 0x273   : > { %1691 = vmatprep.subr.bf16.mxu1 %v2034_v0  ;;  %1697 = vmatprep.subr.bf16.mxu0 %v2034_v0 }
 0x278   : > { %1682 = vmatmul.mubr.msk.bf16.vlgmr.msra.gmra.mrb[4].mxu1 %vm838_vm2, %v532_v52  ;;  %1688 = vmatmul.mubr.msk.bf16.vlgmr.msra.gmra.mrb[8].mxu0 %vm838_vm2, %v533_v53 }
 0x279   : > { %1693 = vmatprep.mubr.msk.bf16.mxu1 %vm2035_vm0, %v2034_v0  ;;  %1699 = vmatprep.mubr.msk.bf16.mxu0 %vm2035_vm0, %v2034_v0 }
 0x343   : > { %v879_v54 = vpop.f32.mrb[0].mxu1  ;;  %v925_v55 = vpop.f32.mrb[4].mxu0 }
 0x344   : > { %v1023_v57 = vmul.f32 0.35355338, %v879_v54  ;;  %v1024_v58 = vmul.f32 0.35355338, %v925_v55  ;;  %v1671_v59 = vpop.f32.mrb[1].mxu1  ;;  %v1677_v60 = vpop.f32.mrb[5].mxu0 }
 0x345   : > { %v882_v61 = vpop.f32.mrb[2].mxu1  ;;  %v928_v62 = vpop.f32.mrb[6].mxu0 }
 0x346   : > { %v1672_v63 = vpop.f32.mrb[3].mxu1  ;;  %v1678_v1 = vpop.f32.mrb[7].mxu0  ;;  %v1027_v2 = vadd.f32 %v1023_v57, %v378_v56  ;;  %v1028_v3 = vadd.f32 %v1024_v58, %v378_v56 }
 0x348   : > { %v1031_v4 = vsel %vm838_vm2, %v1027_v2, -inf  ;;  %v1034_v5 = vsel %vm838_vm2, %v1028_v3, -inf }
 0x349   : > { %1032 = vmax.xlane.f32.xlu1 %v1031_v4  ;;  %1035 = vmax.xlane.f32.xlu0 %v1034_v5 }
 0x34b   : > { %v971_v7 = vpop.f32.mrb[4].mxu1  ;;  %v1017_v8 = vpop.f32.mrb[8].mxu0 }
 0x34c   : > { %v1025_v9 = vmul.f32 0.35355338, %v971_v7  ;;  %v1026_v13 = vmul.f32 0.35355338, %v1017_v8  ;;  %v1683_v14 = vpop.f32.mrb[5].mxu1  ;;  %v1689_v15 = vpop.f32.mrb[9].mxu0 }
 0x34d   : > { %v974_v16 = vpop.f32.mrb[6].mxu1  ;;  %v1020_v17 = vpop.f32.mrb[10].mxu0 }
 0x34e   : > { %v1684_v18 = vpop.f32.mrb[7].mxu1  ;;  %v1690_v19 = vpop.f32.mrb[11].mxu0  ;;  %v1029_v20 = vadd.f32 %v1025_v9, %v378_v56  ;;  %v1030_v21 = vadd.f32 %v1026_v13, %v378_v56 }
 0x350   : > { %v1037_v23 = vsel %vm838_vm2, %v1029_v20, -inf  ;;  %v1040_v24 = vsel %vm838_vm2, %v1030_v21, -inf }
 0x351   : > { %1038 = vmax.xlane.f32.xlu0 %v1037_v23  ;;  %1041 = vmax.xlane.f32.xlu1 %v1040_v24 }
 0x362   : > { %688 = vrot.lane.b32.xlu1 %v2319_v10, %s2042_s16 }
 0x367   : > { %686 = vrot.lane.b32.xlu0 %v2313_v6, %s2042_s16 }
 0x3d6   : > { %v1033_v25 = vpop.xlane.xlu1 %1032  ;;  %v1036_v26 = vpop.xlane.xlu0 %1035 }
 0x3d7   : > { %v1043_v27 = vsub.f32 %v1027_v2, %v1033_v25  ;;  %v1044_v28 = vsub.f32 %v1028_v3, %v1036_v26 }
 0x3d9   : > { %v1047_v29 = vmul.f32 1.442695, %v1043_v27  ;;  %v1049_v30 = vmul.f32 1.442695, %v1044_v28 }
 0x3db   : > { %1818 = vpow2.f32 %v1047_v29 }
 0x3dc   : > { %1820 = vpow2.f32 %v1049_v30 }
 0x3de   : > { %v1042_v6 = vpop.xlane.xlu1 %1041  ;;  %v1039_v35 = vpop.xlane.xlu0 %1038 }
 0x3df   : > { %v1046_v36 = vsub.f32 %v1030_v21, %v1042_v6  ;;  %v1045_v37 = vsub.f32 %v1029_v20, %v1039_v35 }
 0x3e1   : > { %v1053_v38 = vmul.f32 1.442695, %v1046_v36  ;;  %v1051_v39 = vmul.f32 1.442695, %v1045_v37 }
 0x3e2   : > { %v689_v43 = vpop.permute.xlu1 %688 }
 0x3e3   : > { %1822 = vpow2.f32 %v1053_v38 }
 0x3e4   : > { %1824 = vpow2.f32 %v1051_v39 }
 0x3e5   : > { %v2398_v31 = vpop.eup %1818 }
 0x3e6   : > { %v2400_v33 = vpop.eup %1820  ;;  %v1055_v34 = vsel %vm838_vm2, %v2398_v31, 0.0 }
 0x3e7   : > { %1056 = vadd.xlane.f32.xlu0 %v1055_v34  ;;  %v1058_v10 = vsel %vm838_vm2, %v2400_v33, 0.0 }
 0x3e8   : > { %1059 = vadd.xlane.f32.xlu1 %v1058_v10 }
 0x3ed   : > { %v2408_v40 = vpop.eup %1822 }
 0x3ee   : > { %v2410_v41 = vpop.eup %1824  ;;  %v1064_v42 = vsel %vm838_vm2, %v2408_v40, 0.0 }
 0x3f9   : > { %690 = vrot.lane.b32.xlu1 %v2324_v12, %s2042_s16  ;;  %v1061_v12 = vsel %vm838_vm2, %v2410_v41, 0.0 }
 0x3fd   : > { %692 = vrot.lane.b32.xlu0 %v2322_v11, %s2042_s16  ;;  %v687_v11 = vpop.permute.xlu0 %686  ;;  %s2046_s16 = smov [#allocation10]  }
 0x41c   : > { %1065 = vadd.xlane.f32.xlu0 %v1064_v42 }
 0x41d   : > { %1062 = vadd.xlane.f32.xlu1 %v1061_v12 }
 0x474   : > { %v1057_v44 = vpop.xlane.xlu0 %1056 }
 0x475   : > { %v1060_v45 = vpop.xlane.xlu1 %1059  ;;  %1826 = vrcp.f32 %v1057_v44 }
 0x476   : > { %1828 = vrcp.f32 %v1060_v45 }
 0x478   : > { %v693_v46 = vpop.permute.xlu0 %692 }
 0x479   : > { %v714_v47 = vcombine.low %v689_v43, %v693_v46  ;;  %v715_v48 = vcombine.high %v689_v43, %v693_v46  ;;  %v691_v49 = vpop.permute.xlu1 %690 }
 0x47a   : > { %v698_v50 = vcombine.low %v687_v11, %v691_v49  ;;  %v699_v51 = vcombine.high %v687_v11, %v691_v49 }
 0x47b   : > { %v722_v52 = vrot.slane %v714_v47, %v2332_v22  ;;  %v729_v53 = vrot.slane %v715_v48, %v2332_v22 }
 0x47c   : > { %v706_v54 = vrot.slane %v698_v50, %v2332_v22  ;;  %v713_v55 = vrot.slane %v699_v51, %v2332_v22 }
 0x47e   : > { %v730_v56 = vcombine.low %v706_v54, %v722_v52  ;;  %v731_v57 = vcombine.high %v706_v54, %v722_v52  ;;  %v746_v58 = vcombine.low %v713_v55, %v729_v53  ;;  %v747_v59 = vcombine.high %v713_v55, %v729_v53 }
 0x47f   : > { %v1827_v19 = vpop.eup %1826 }
 0x480   : > { %v738_v60 = vrot.slane %v730_v56, %v2342_v32  ;;  %v745_v61 = vrot.slane %v731_v57, %v2342_v32  ;;  %v754_v62 = vrot.slane %v746_v58, %v2342_v32  ;;  %v761_v63 = vrot.slane %v747_v59, %v2342_v32  ;;  %v1829_v23 = vpop.eup %1828 }
 0x481   : > { %v1071_v28 = vmul.f32 %v1827_v19, %v2398_v31  ;;  %v1072_v29 = vmul.f32 %v1829_v23, %v2400_v33 }
 0x482   : > { %v766_v1 = vcombine.low %v738_v60, %v745_v61  ;;  %v1617_v2 = vcombine.high %v738_v60, %v745_v61  ;;  %v782_v3 = vcombine.low %v754_v62, %v761_v63  ;;  %v1618_v4 = vcombine.high %v754_v62, %v761_v63 }
 0x483   : > { %v1075_v37 = vpack.c.bf16 %v1071_v28, %v1071_v28  ;;  %v1076_v38 = vpack.c.bf16 %v1072_v29, %v1072_v29 }
 0x484   : > { %v773_v5 = vrot.slane %v766_v1, %v2332_v22  ;;  %v781_v7 = vrot.slane %v1617_v2, %v2332_v22  ;;  %v789_v8 = vrot.slane %v782_v3, %v2332_v22  ;;  %v797_v9 = vrot.slane %v1618_v4, %v2332_v22 }
 0x486   : > { %v798_v13 = vcombine.low %v773_v5, %v781_v7  ;;  %v799_v14 = vcombine.high %v773_v5, %v781_v7  ;;  %v814_v15 = vcombine.low %v789_v8, %v797_v9  ;;  %v815_v16 = vcombine.high %v789_v8, %v797_v9 }
 0x488   : > { %v806_v17 = vrot.slane %v798_v13, %v2342_v32  ;;  %v813_v18 = vrot.slane %v799_v14, %v2342_v32  ;;  %v822_v20 = vrot.slane %v814_v15, %v2342_v32  ;;  %v829_v21 = vrot.slane %v815_v16, %v2342_v32  ;;  %v1816_v14 = vld [vmem:[#allocation8] sm:$0xff]  }
 0x48a   : > { %v830_v24 = vcombine.low %v806_v17, %v822_v20  ;;  %v831_v25 = vcombine.high %v806_v17, %v822_v20  ;;  %v832_v26 = vcombine.low %v813_v18, %v829_v21  ;;  %v833_v27 = vcombine.high %v813_v18, %v829_v21 }
 0x48c   : > { %v834_v30 = vpack.c.bf16 %v830_v24, %v830_v24  ;;  %v835_v34 = vpack.c.bf16 %v831_v25, %v831_v25  ;;  %v836_v35 = vpack.c.bf16 %v832_v26, %v832_v26  ;;  %v837_v36 = vpack.c.bf16 %v833_v27, %v833_v27  ;;  %v1817_v24 = vld [vmem:[#allocation8 + $0x8] sm:$0xff]  }
 0x48e   : > { %v1084_v10 = vsel %vm1082_vm3, %v834_v30, 0  ;;  %v1130_v6 = vsel %vm1082_vm3, %v835_v34, 0  ;;  %v1176_v31 = vsel %vm1082_vm3, %v836_v35, 0  ;;  %v1222_v33 = vsel %vm1082_vm3, %v837_v36, 0 }
 0x48f   : > { %1692 = vmatpush3.bf16.msra.mxu1 %v1084_v10  ;;  %1698 = vmatpush3.bf16.msra.mxu0 %v1130_v6 }
 0x490   : > { %1703 = vmatprep.subr.bf16.mxu1 %v2034_v0  ;;  %1709 = vmatprep.subr.bf16.mxu0 %v2034_v0 }
 0x492   : > { %1694 = vmatmul.mubr.msk.bf16.vlgmr.msra.gmra.mrb[8].mxu1 %vm838_vm2, %v1075_v37  ;;  %1700 = vmatmul.mubr.msk.bf16.vlgmr.msra.gmra.mrb[12].mxu0 %vm838_vm2, %v1076_v38 }
 0x493   : > { %1704 = vmatpush3.bf16.msra.mxu1 %v1176_v31  ;;  %1710 = vmatpush3.bf16.msra.mxu0 %v1222_v33 }
 0x494   : > { %1705 = vmatprep.mubr.msk.bf16.mxu1 %vm2035_vm0, %v2034_v0  ;;  %1711 = vmatprep.mubr.msk.bf16.mxu0 %vm2035_vm0, %v2034_v0 }
 0x495   : > { %1715 = vmatprep.subr.bf16.mxu1 %v2034_v0 }
 0x4a9   : > { %v1066_v39 = vpop.xlane.xlu0 %1065 }
 0x4aa   : > { %1830 = vrcp.f32 %v1066_v39  ;;  %v1063_v42 = vpop.xlane.xlu1 %1062 }
 0x4ab   : > { %1832 = vrcp.f32 %v1063_v42 }
 0x4b4   : > { %v1831_v12 = vpop.eup %1830 }
 0x4b5   : > { %v1833_v11 = vpop.eup %1832  ;;  %v1074_v43 = vmul.f32 %v1831_v12, %v2408_v40 }
 0x4b6   : > { %v1073_v44 = vmul.f32 %v1833_v11, %v2410_v41 }
 0x4b7   : > { %v1078_v45 = vpack.c.bf16 %v1074_v43, %v1074_v43 }
 0x4b8   : > { %v1077_v46 = vpack.c.bf16 %v1073_v44, %v1073_v44  ;;  %v1629_v44 = vld [vmem:[%s2530_s5] ss:$0 sm:$0xff] }
 0x4b9   : > { %1712 = vmatmul.mubr.msk.bf16.vlgmr.msra.gmra.mrb[16].mxu0 %vm838_vm2, %v1078_v45 }
 0x4ba   : > { %1706 = vmatmul.mubr.msk.bf16.vlgmr.msra.gmra.mrb[12].mxu1 %vm838_vm2, %v1077_v46 }
 0x4bb   : > { %1719 = vmatprep.mubr.msk.bf16.mxu1 %vm2035_vm0, %v2034_v0  ;;  %1716 = vmatpush3.bf16.msra.mxu1 %v1816_v14 }
 0x4bc   : > { %1717 = vmatprep.subr.bf16.mxu1 %v2034_v0 }
 0x4bf   : > { %1718 = vmatpush3.bf16.msra.mxu1 %v1817_v24 }
 0x565   : > { %v1120_v47 = vpop.f32.mrb[8].mxu1  ;;  %v1166_v48 = vpop.f32.mrb[12].mxu0 }
 0x566   : > { %v1695_v49 = vpop.f32.mrb[9].mxu1  ;;  %v1701_v50 = vpop.f32.mrb[13].mxu0 }
 0x567   : > { %v1123_v51 = vpop.f32.mrb[10].mxu1  ;;  %v1169_v52 = vpop.f32.mrb[14].mxu0 }
 0x568   : > { %v1696_v53 = vpop.f32.mrb[11].mxu1  ;;  %v1702_v54 = vpop.f32.mrb[15].mxu0 }
 0x58c   : > { %v1258_v40 = vpop.f32.mrb[16].mxu0 }
 0x58d   : > { %v1212_v55 = vpop.f32.mrb[12].mxu1  ;;  %v1280_v41 = vcombine.low %v1166_v48, %v1258_v40  ;;  %v1281_v56 = vcombine.high %v1166_v48, %v1258_v40  ;;  %v1713_v57 = vpop.f32.mrb[17].mxu0 }
 0x58e   : > { %v1264_v58 = vcombine.low %v1120_v47, %v1212_v55  ;;  %v1265_v59 = vcombine.high %v1120_v47, %v1212_v55  ;;  %v1707_v60 = vpop.f32.mrb[13].mxu1  ;;  %v1261_v61 = vpop.f32.mrb[18].mxu0 }
 0x58f   : > { %v1288_v62 = vrot.slane %v1280_v41, %v2332_v22  ;;  %v1295_v63 = vrot.slane %v1281_v56, %v2332_v22  ;;  %v1215_v1 = vpop.f32.mrb[14].mxu1  ;;  %v1714_v2 = vpop.f32.mrb[19].mxu0 }
 0x590   : > { %v1272_v3 = vrot.slane %v1264_v58, %v2332_v22  ;;  %v1279_v4 = vrot.slane %v1265_v59, %v2332_v22  ;;  %v1708_v5 = vpop.f32.mrb[15].mxu1 }
 0x592   : > { %v1296_v7 = vcombine.low %v1272_v3, %v1288_v62  ;;  %v1297_v8 = vcombine.high %v1272_v3, %v1288_v62  ;;  %v1312_v9 = vcombine.low %v1279_v4, %v1295_v63  ;;  %v1313_v13 = vcombine.high %v1279_v4, %v1295_v63 }
 0x594   : > { %v1304_v15 = vrot.slane %v1296_v7, %v2342_v32  ;;  %v1311_v16 = vrot.slane %v1297_v8, %v2342_v32  ;;  %v1320_v17 = vrot.slane %v1312_v9, %v2342_v32  ;;  %v1327_v18 = vrot.slane %v1313_v13, %v2342_v32 }
 0x596   : > { %v1332_v19 = vcombine.low %v1304_v15, %v1311_v16  ;;  %v1627_v20 = vcombine.high %v1304_v15, %v1311_v16  ;;  %v1348_v21 = vcombine.low %v1320_v17, %v1327_v18  ;;  %v1628_v23 = vcombine.high %v1320_v17, %v1327_v18 }
 0x598   : > { %v1339_v25 = vrot.slane %v1332_v19, %v2332_v22  ;;  %v1347_v26 = vrot.slane %v1627_v20, %v2332_v22  ;;  %v1355_v27 = vrot.slane %v1348_v21, %v2332_v22  ;;  %v1363_v28 = vrot.slane %v1628_v23, %v2332_v22 }
 0x59a   : > { %v1365_v29 = vcombine.high %v1339_v25, %v1347_v26  ;;  %v1381_v30 = vcombine.high %v1355_v27, %v1363_v28  ;;  %v1364_v34 = vcombine.low %v1339_v25, %v1347_v26  ;;  %v1380_v10 = vcombine.low %v1355_v27, %v1363_v28 }
 0x59c   : > { %v1379_v0 = vrot.slane %v1365_v29, %v2342_v32  ;;  %v1395_v6 = vrot.slane %v1381_v30, %v2342_v32  ;;  %v1372_v35 = vrot.slane %v1364_v34, %v2342_v32  ;;  %v1388_v36 = vrot.slane %v1380_v10, %v2342_v32 }
 0x59e   : > { %v1398_v37 = vcombine.low %v1379_v0, %v1395_v6  ;;  %v1397_v38 = vcombine.high %v1372_v35, %v1388_v36  ;;  %v1399_v31 = vcombine.high %v1379_v0, %v1395_v6  ;;  %v1396_v33 = vcombine.low %v1372_v35, %v1388_v36 }
 0x5a0   : > { %1405 = vrot.lane.b32.xlu1 %v1398_v37, %s2043_s19  ;;  %1401 = vrot.lane.b32.xlu0 %v1397_v38, %s2044_s26  ;;  %s1952_s19 = sshll.u32 %s2046_s16, 4  ;;  %s1953_s19 = int_to_ptr.vmem [resolvable:$false] %s1952_s19 }
 0x5a1   : > { %s1954_s26 = scalar_lea.vmem %s1953_s19, 256  ;;  %p1955_p2 = scmp.lt.s32.totalorder %s2482_s29, %s1953_s19 }
 0x5a2   : > { %p1956_p4 = scmp.lt.s32.totalorder %s1954_s26, %s1948_s9 }
 0x5a4   : > { %1409 = vrot.lane.b32.xlu1 %v1399_v31, %s2045_s13  ;;  %p1957_p0 = por %p1956_p4, %p1955_p2 }
 0x5a6   : > { %p1958_p9 = pnand %p1957_p0, %p1951_p1 }
 0x612   : > { %v1406_v22 = vpop.permute.xlu1 %1405  ;;  %v1402_v39 = vpop.permute.xlu0 %1401 }
 0x613   : > { %v1412_v42 = vsel %vm838_vm2, %v1396_v33, %v1402_v39 }
 0x614   : > { %v1414_v32 = vsel %vm1413_vm4, %v1412_v42, %v1406_v22 }
 0x616   : > { %v1410_v12 = vpop.permute.xlu1 %1409 }
 0x617   : > { %v1416_v11 = vsel %vm1415_vm5, %v1414_v32, %v1410_v12 }
 0x618   : > { %v1417_v43 = vpack.c.bf16 %v1416_v11, %v1416_v11 }
 0x61a   : > { %1720 = vmatmul.mubr.msk.bf16.vlgmr.msra.gmra.mrb[16].mxu1 %vm334_vm1, %v1417_v43 }
 0x6ed   : > { %v1473_v45 = vpop.f32.mrb[16].mxu1 }
 0x6ee   : > { %v1474_v46 = vadd.f32 %v1629_v44, %v1473_v45  ;;  %v1721_v47 = vpop.f32.mrb[17].mxu1 }
 0x6ef   : > { %v1476_v48 = vpop.f32.mrb[18].mxu1 }
 0x6f0   : > { %v1722_v49 = vpop.f32.mrb[19].mxu1  ;;  %1479 = vst.msk [vmem:[%s308_s27] sm:$0xff] %vm334_vm1, %v1474_v46 }
 0x6f1   : > { %1961 = shalt.err (!%p1958_p9)
}
 0x6f2   : > { %s1962_s17 = scalar_lea.hbm %s2480_s11, 128  ;;  %s1966_s10 = scalar_lea.hbm %s2531_s6, 256 }
 0x6f3   : > { %p1963_p8 = scmp.ne.s32.totalorder %s2480_s11, %s1962_s17  ;;  %p1967_p6 = scmp.lt.u32.totalorder %s2480_s11, %s2531_s6 }
 0x6f4   : > { %p1968_p10 = scmp.lt.u32.totalorder %s1966_s10, %s1962_s17  ;;  %p1970_p7 = scmp.lt.u32.totalorder %s1962_s17, %s2480_s11 }
 0x6f5   : > { %p1964_p11 = pnand %p1963_p8, %p2233_p5 }
 0x6f6   : > { %p1969_p3 = por %p1968_p10, %p1967_p6 }
 0x6f7   : > { %p1965_p13 = pneg %p1964_p11 }
 0x6f8   : > { %p1971_p12 = por %p1970_p7, %p1969_p3 }
 0x6fa   : > { %p1972_p1 = pnand %p1971_p12, %p1965_p13 }
 0x6fc   : > { %1975 = shalt.err (!%p1972_p1)
}
 0x6fd   : > { %1737 = dma.vmem_to_hbm [thread:$0]  (%p2233_p5), %s2482_s29, 128, %s2480_s11, %s1481_s25  }
 0x6fe PF: > { %s1506_s27 = sand.u32 1, %s2014_s21   ;;  %p2551_p2 = scmp.ne.s32.totalorder %s2536_s28, 0 }
 0x6ff   : > { %p2552_p4 = scmp.ge.s32.totalorder %s2026_s24, 2  ;;  %s1507_s20 = scalar_lea.sflag [#allocation4], %s1506_s27 }
 0x701   : > { %p1754_p0 = pnand %p2552_p4, %p2551_p2 }
 0x703   : > { %2009 = dma.done.wait (!%p1754_p0), %s1507_s20, 128  }
 0x704   : > { %2011 = vsyncadd (!%p1754_p0), %s1507_s20, 4294967168  ;;  %p21_p9 = scmp.ge.s32.totalorder %s2219_s8, 4   ;;  %s2553_s21 = smov %s2018_s22 }
 0x705   : > { %s2554_s22 = smov %s2022_s23  ;;  %s2555_s23 = smov %s2229_s14 }
 0x706   : > { %s2556_s24 = smov %s2219_s8  ;;  %23 = sbr.rel (!%p21_p9) target bundleno = 7 (0x7), region = 102 }
 0x70d   :  { %1512 = vsyncpa [#allocation3], 1 }
 0x70e   :  { %1514 = vsyncpa [#allocation3 + $0x1], 1 }
 0x70f   :  { %1515 = vsyncpa [#allocation6], 1 }
 0x710   :  { %1517 = vsyncpa [#allocation6 + $0x1], 1 }
 0x711   :  { %1518 = vsyncpa [#allocation9], 1 }
 0x712   :  { %1519 = vsyncpa [#allocation4], 1 }
 0x713   :  { %1521 = vsyncpa [#allocation4 + $0x1], 1 }

</bundles_post_ra>
